<compile_context>
chip_gen: v7x
topology: tpu7x:2x2x1
jax: 0.10.0
libtpu: 0.0.40
codegen_flags: <defaults>
</compile_context>

<pallas_src>
import math
import functools

import jax
import jax.numpy as jnp
from jax import lax
from jax.experimental import pallas as pl
from jax.experimental.pallas import tpu as pltpu


def _encoder_layer_kernel(
        x_ref, bias_ref,
        wq_ref, wk_ref, wv_ref, wo_ref,
        ln_attn_c_ref, ln_attn_p_ref,
        w1_c_ref, b1_c_ref, w1_p_ref, b1_p_ref,
        w2_c_ref, b2_c_ref, w2_p_ref, b2_p_ref,
        ln_ff_c_ref, ln_ff_p_ref,
        out_ref,
        o_scr,
        *, n_head, d_qkv, f_half, ln_eps, mxu_dtype):
    f32 = jnp.float32
    d_model = 2 * f_half
    qk_dims = (((1,), (1,)), ((), ()))   # contract last dims of both: a @ b^T

    def mm(a, b):
        return jnp.dot(a, b, preferred_element_type=f32)

    def partitioned_layer_norm(y_c, y_p, gb_c, gb_p):
        # LayerNorm over the full (content ++ position) feature axis, computed
        # from per-half partial sums (no lane concatenation).
        total = (jnp.sum(y_c, axis=-1, keepdims=True)
                 + jnp.sum(y_p, axis=-1, keepdims=True))
        mean = total * (1.0 / d_model)
        d_c = y_c - mean
        d_p = y_p - mean
        var = (jnp.sum(d_c * d_c, axis=-1, keepdims=True)
               + jnp.sum(d_p * d_p, axis=-1, keepdims=True)) * (1.0 / d_model)
        rstd = lax.rsqrt(var + ln_eps)
        n_c = d_c * rstd * gb_c[0:1, :] + gb_c[1:2, :]
        n_p = d_p * rstd * gb_p[0:1, :] + gb_p[1:2, :]
        return n_c, n_p

    x = x_ref[0]                        # [T, d_model] f32
    bias = bias_ref[0]                  # [1, T] additive key-mask bias (0 / -1e30)
    x_m = x.astype(mxu_dtype)           # cast once, reused by all 3 projections

    # ---- Fused partitioned QKV projection ----
    # Block-structured weights [d_model, H*d_qkv]: K = d_model fills the MXU
    # depth and the output columns are per-head (content ‖ position) contiguous
    # (1/sqrt(d_qkv) folded into wq).
    q = mm(x_m, wq_ref[...]).astype(mxu_dtype)      # [T, H*d_qkv]
    k = mm(x_m, wk_ref[...]).astype(mxu_dtype)
    v = mm(x_m, wv_ref[...]).astype(mxu_dtype)

    # ---- Per-head attention core ----
    # Static loop (n_head <= 8); live ranges are bounded because each head's
    # output goes straight into the o_scr VMEM scratch (no list + lane concat).
    for h in range(n_head):
        lo, hi = h * d_qkv, (h + 1) * d_qkv
        dots = lax.dot_general(q[:, lo:hi], k[:, lo:hi], qk_dims,
                               preferred_element_type=f32)    # [T, T], K=d_qkv
        dots = dots + bias
        m = jnp.max(dots, axis=-1, keepdims=True)
        e = jnp.exp(dots - m)                                 # unnormalized probs
        l = jnp.sum(e, axis=-1, keepdims=True)
        # attention dropout: identity in eval mode
        pv = mm(e.astype(mxu_dtype), v[:, lo:hi])             # [T, d_qkv]
        # deferred softmax normalization: exact divide on [T, d_qkv], not [T, T]
        o_scr[:, lo:hi] = (pv * (1.0 / l)).astype(o_scr.dtype)

    # Output projection: contraction over (head, partition, a) IS the head sum;
    # result is lane-dense [T, d_model] (content cols then position cols).
    attn = mm(o_scr[...], wo_ref[...])

    # residual (dropout = identity) + LayerNorm over full d_model
    x_c, x_p = x[:, :f_half], x[:, f_half:]
    y_c, y_p = partitioned_layer_norm(
        x_c + attn[:, :f_half], x_p + attn[:, f_half:],
        ln_attn_c_ref[...], ln_attn_p_ref[...])

    # ---- Partitioned feed-forward: Linear -> ReLU -> Linear ----
    h_c = jnp.maximum(mm(y_c.astype(mxu_dtype), w1_c_ref[...]) + b1_c_ref[...], 0.0)
    h_p = jnp.maximum(mm(y_p.astype(mxu_dtype), w1_p_ref[...]) + b1_p_ref[...], 0.0)
    r_c = mm(h_c.astype(mxu_dtype), w2_c_ref[...]) + b2_c_ref[...]
    r_p = mm(h_p.astype(mxu_dtype), w2_p_ref[...]) + b2_p_ref[...]

    z_c, z_p = partitioned_layer_norm(y_c + r_c, y_p + r_p,
                                      ln_ff_c_ref[...], ln_ff_p_ref[...])
    out_ref[0, :, :f_half] = z_c.astype(out_ref.dtype)
    out_ref[0, :, f_half:] = z_p.astype(out_ref.dtype)


def _prep_layer_weights(p, d_qkv, mxu_dtype):
    """One-time reshape of PyTorch-shaped params into kernel-friendly layout."""
    n_head, f_half, _, a_half = p['w_qkv_c'].shape
    assert 2 * a_half == d_qkv
    d_model = 2 * f_half
    hd = n_head * d_qkv
    scale = 1.0 / math.sqrt(d_qkv)
    wd = mxu_dtype

    def fuse_qkv(idx, s=1.0):
        # [H, F_half, 3, A_half] x2 -> block-structured [d_model, H*d_qkv]:
        #   rows 0:f_half,  cols [h*d_qkv : h*d_qkv+a_half]      <- content w
        #   rows f_half: ,  cols [h*d_qkv+a_half : (h+1)*d_qkv]  <- position w
        wc = jnp.transpose(p['w_qkv_c'][:, :, idx, :], (1, 0, 2)) * s  # [F_half,H,A_half]
        wp = jnp.transpose(p['w_qkv_p'][:, :, idx, :], (1, 0, 2)) * s
        top = jnp.concatenate([wc, jnp.zeros_like(wc)], axis=-1).reshape(f_half, hd)
        bot = jnp.concatenate([jnp.zeros_like(wp), wp], axis=-1).reshape(f_half, hd)
        return jnp.concatenate([top, bot], axis=0).astype(wd)          # [d_model, hd]

    def fuse_wo():
        # [H, A_half, F_half] x2 -> block-structured [H*d_qkv, d_model]:
        # per-head content rows feed content output cols, position rows feed
        # position output cols.
        woc, wop = p['w_o_c'], p['w_o_p']
        top = jnp.concatenate([woc, jnp.zeros_like(woc)], axis=-1)     # [H,A_half,d_model]
        bot = jnp.concatenate([jnp.zeros_like(wop), wop], axis=-1)
        return jnp.concatenate([top, bot], axis=1).reshape(hd, d_model).astype(wd)

    def stack_ln(gamma, beta):
        return jnp.stack([gamma, beta]).astype(jnp.float32)            # [2, F_half]

    return (
        fuse_qkv(0, scale), fuse_qkv(1), fuse_qkv(2), fuse_wo(),
        stack_ln(p['ln_attn_g'][:f_half], p['ln_attn_b'][:f_half]),
        stack_ln(p['ln_attn_g'][f_half:], p['ln_attn_b'][f_half:]),
        p['w1_c'].astype(wd), p['b1_c'][None, :].astype(jnp.float32),
        p['w1_p'].astype(wd), p['b1_p'][None, :].astype(jnp.float32),
        p['w2_c'].astype(wd), p['b2_c'][None, :].astype(jnp.float32),
        p['w2_p'].astype(wd), p['b2_p'][None, :].astype(jnp.float32),
        stack_ln(p['ln_ff_g'][:f_half], p['ln_ff_b'][:f_half]),
        stack_ln(p['ln_ff_g'][f_half:], p['ln_ff_b'][f_half:]),
    )


def _encoder_layer(x, mask_bias, weights, *, n_head, d_qkv, mxu_dtype):
    B, T, d_model = x.shape
    f_half = d_model // 2
    hd = n_head * d_qkv
    kernel = functools.partial(
        _encoder_layer_kernel, n_head=n_head, d_qkv=d_qkv, f_half=f_half,
        ln_eps=1e-5, mxu_dtype=mxu_dtype)

    x_spec = pl.BlockSpec((1, T, d_model), lambda b: (b, 0, 0))
    bias_spec = pl.BlockSpec((1, 1, T), lambda b: (b, 0, 0))
    # Full-array, constant-index blocks: weights are DMA'd once and stay
    # resident across the batch grid.
    w_specs = [pl.BlockSpec(w.shape, lambda b: (0, 0)) for w in weights]

    # Explicit scoped-VMEM budget: weights (x2 for default double buffering) +
    # double-buffered x/out/bias blocks + q/k/v/o buffers + per-head [T,T]
    # temporaries, with 2x headroom (at least the 32 MiB default, capped at
    # v7x's 64 MiB per-core VMEM).
    est = (2 * sum(int(w.size) * w.dtype.itemsize for w in weights)
           + 4 * (T * d_model * 4 + T * 4)
           + 4 * T * hd * 4
           + 4 * T * T * 4)
    vmem_limit = int(min(64 * 1024 * 1024, max(2 * est, 32 * 1024 * 1024)))

    return pl.pallas_call(
        kernel,
        out_shape=jax.ShapeDtypeStruct((B, T, d_model), x.dtype),
        grid_spec=pltpu.PrefetchScalarGridSpec(
            num_scalar_prefetch=0,
            grid=(B,),
            in_specs=[x_spec, bias_spec] + w_specs,
            out_specs=x_spec,
            scratch_shapes=[pltpu.VMEM((T, hd), mxu_dtype)],
        ),
        compiler_params=pltpu.CompilerParams(
            dimension_semantics=("parallel",),
            vmem_limit_bytes=vmem_limit),
    )(x, mask_bias, *weights)


def partitioned_transformer_encoder(x, layer_params, d_qkv, mask=None,
                                    mxu_dtype=jnp.bfloat16):
    """x: [B, T, d_model]; mask: optional bool [B, T] (True = keep key).

    mxu_dtype=jnp.bfloat16 is the deployment default (softmax / LayerNorm stay
    f32); pass jnp.float32 for exact parity with the PyTorch module.
    """
    B, T, d_model = x.shape
    n_head = layer_params[0]['w_qkv_c'].shape[0]

    if mask is None:
        mask_bias = jnp.zeros((B, 1, T), jnp.float32)
    else:
        mask_bias = jnp.where(mask, 0.0, -1e30).astype(jnp.float32)[:, None, :]

    for p in layer_params:
        weights = _prep_layer_weights(p, d_qkv, mxu_dtype)
        x = _encoder_layer(x, mask_bias, weights, n_head=n_head, d_qkv=d_qkv,
                           mxu_dtype=mxu_dtype)
    return x


# ----------------------------- pure-JAX reference -----------------------------

def _reference_layer(x, p, d_qkv, mask=None, ln_eps=1e-5):
    f_half = x.shape[-1] // 2
    a_half = d_qkv // 2
    scale = 1.0 / math.sqrt(d_qkv)
    x_c, x_p = x[..., :f_half], x[..., f_half:]

    qkv_c = jnp.einsum('btf,hfca->bhtca', x_c, p['w_qkv_c'])
    qkv_p = jnp.einsum('btf,hfca->bhtca', x_p, p['w_qkv_p'])
    q = jnp.concatenate([qkv_c[..., 0, :], qkv_p[..., 0, :]], axis=-1) * scale
    k = jnp.concatenate([qkv_c[..., 1, :], qkv_p[..., 1, :]], axis=-1)
    v = jnp.concatenate([qkv_c[..., 2, :], qkv_p[..., 2, :]], axis=-1)
    dots = jnp.einsum('bhqa,bhka->bhqk', q, k)
    if mask is not None:
        dots = jnp.where(mask[:, None, None, :], dots, -1e30)
    probs = jax.nn.softmax(dots, axis=-1)
    o = jnp.einsum('bhqk,bhka->bhqa', probs, v)
    out_c = jnp.einsum('bhta,haf->btf', o[..., :a_half], p['w_o_c'])
    out_p = jnp.einsum('bhta,haf->btf', o[..., a_half:], p['w_o_p'])
    residual = jnp.concatenate([out_c, out_p], axis=-1)

    def layer_norm(y, g, b):
        mean = jnp.mean(y, axis=-1, keepdims=True)
        var = jnp.mean(jnp.square(y - mean), axis=-1, keepdims=True)
        return (y - mean) / jnp.sqrt(var + ln_eps) * g + b

    x = layer_norm(x + residual, p['ln_attn_g'], p['ln_attn_b'])

    x_c, x_p = x[..., :f_half], x[..., f_half:]
    h_c = jax.nn.relu(x_c @ p['w1_c'] + p['b1_c'])
    h_p = jax.nn.relu(x_p @ p['w1_p'] + p['b1_p'])
    r_c = h_c @ p['w2_c'] + p['b2_c']
    r_p = h_p @ p['w2_p'] + p['b2_p']
    residual = jnp.concatenate([r_c, r_p], axis=-1)
    return layer_norm(x + residual, p['ln_ff_g'], p['ln_ff_b'])


def _reference_encoder(x, layer_params, d_qkv, mask=None):
    for p in layer_params:
        x = _reference_layer(x, p, d_qkv, mask=mask)
    return x


if __name__ == "__main__":
    # module config (small but shape-consistent with the PyTorch module)
    d_model = 32
    n_head = 4
    d_qkv = 16
    d_ff = 64
    n_layers = 2
    B, T = 2, 8
    initializer_range = 0.02
    bound = math.sqrt(3.0) * initializer_range

    f_half = d_model // 2
    a_half = d_qkv // 2
    ff_half = d_ff // 2

    key = jax.random.PRNGKey(0)
    key, kx = jax.random.split(key)
    x = jax.random.normal(kx, (B, T, d_model), dtype=jnp.float32)

    def uni(k, shape, b):
        return jax.random.uniform(k, shape, minval=-b, maxval=b, dtype=jnp.float32)

    layer_params = []
    for _ in range(n_layers):
        key, *ks = jax.random.split(key, 17)
        b1 = 1.0 / math.sqrt(f_half)
        b2 = 1.0 / math.sqrt(ff_half)
        layer_params.append(dict(
            w_qkv_c=uni(ks[0], (n_head, f_half, 3, a_half), bound),
            w_qkv_p=uni(ks[1], (n_head, f_half, 3, a_half), bound),
            w_o_c=uni(ks[2], (n_head, a_half, f_half), bound),
            w_o_p=uni(ks[3], (n_head, a_half, f_half), bound),
            w1_c=uni(ks[4], (f_half, ff_half), b1),
            b1_c=uni(ks[5], (ff_half,), b1),
            w1_p=uni(ks[6], (f_half, ff_half), b1),
            b1_p=uni(ks[7], (ff_half,), b1),
            w2_c=uni(ks[8], (ff_half, f_half), b2),
            b2_c=uni(ks[9], (f_half,), b2),
            w2_p=uni(ks[10], (ff_half, f_half), b2),
            b2_p=uni(ks[11], (f_half,), b2),
            ln_attn_g=1.0 + 0.1 * jax.random.normal(ks[12], (d_model,), jnp.float32),
            ln_attn_b=0.1 * jax.random.normal(ks[13], (d_model,), jnp.float32),
            ln_ff_g=1.0 + 0.1 * jax.random.normal(ks[14], (d_model,), jnp.float32),
            ln_ff_b=0.1 * jax.random.normal(ks[15], (d_model,), jnp.float32),
        ))

    ref = _reference_encoder(x, layer_params, d_qkv)

    # f32 MXU operands: exact-semantics / parity path (no mask)
    out = partitioned_transformer_encoder(x, layer_params, d_qkv,
                                          mxu_dtype=jnp.float32)
    out = jax.block_until_ready(out)
    assert jnp.allclose(out, ref, rtol=2e-3, atol=2e-3), "f32 (no mask) mismatch"

    # f32 path with a key mask
    lengths = jnp.array([T, T - 3])
    mask = jnp.arange(T)[None, :] < lengths[:, None]
    out_m = partitioned_transformer_encoder(x, layer_params, d_qkv, mask=mask,
                                            mxu_dtype=jnp.float32)
    out_m = jax.block_until_ready(out_m)
    ref_m = _reference_encoder(x, layer_params, d_qkv, mask=mask)
    assert jnp.allclose(out_m, ref_m, rtol=2e-3, atol=2e-3), "f32 (mask) mismatch"

    # default bf16 MXU path (deployment default); softmax/LayerNorm stay f32
    out_bf16 = partitioned_transformer_encoder(x, layer_params, d_qkv)
    out_bf16 = jax.block_until_ready(out_bf16)
    assert jnp.allclose(out_bf16, ref, rtol=5e-2, atol=5e-2), "bf16 mismatch"

    print("KERNEL_OK")
</pallas_src>

<mosaic_0001>
module attributes {stable_mosaic.version = 11 : i64} {
  func.func @_encoder_layer_kernel(%arg0: i32, %arg1: memref<1x8x32xf32, #tpu.memory_space<vmem>>, %arg2: memref<1x1x8xf32, #tpu.memory_space<vmem>>, %arg3: memref<32x64xf32, #tpu.memory_space<vmem>>, %arg4: memref<32x64xf32, #tpu.memory_space<vmem>>, %arg5: memref<32x64xf32, #tpu.memory_space<vmem>>, %arg6: memref<64x32xf32, #tpu.memory_space<vmem>>, %arg7: memref<2x16xf32, #tpu.memory_space<vmem>>, %arg8: memref<2x16xf32, #tpu.memory_space<vmem>>, %arg9: memref<16x32xf32, #tpu.memory_space<vmem>>, %arg10: memref<1x32xf32, #tpu.memory_space<vmem>>, %arg11: memref<16x32xf32, #tpu.memory_space<vmem>>, %arg12: memref<1x32xf32, #tpu.memory_space<vmem>>, %arg13: memref<32x16xf32, #tpu.memory_space<vmem>>, %arg14: memref<1x16xf32, #tpu.memory_space<vmem>>, %arg15: memref<32x16xf32, #tpu.memory_space<vmem>>, %arg16: memref<1x16xf32, #tpu.memory_space<vmem>>, %arg17: memref<2x16xf32, #tpu.memory_space<vmem>>, %arg18: memref<2x16xf32, #tpu.memory_space<vmem>>, %arg19: memref<1x8x32xf32, #tpu.memory_space<vmem>>, %arg20: memref<8x64xf32, #tpu.memory_space<vmem>>) attributes {dimension_semantics = [#tpu.dimension_semantics<parallel>], iteration_bounds = array<i64: 2>, scalar_prefetch = 0 : i64, scratch_operands = 1 : i64, tpu.core_type = #tpu.core_type<tc>, window_params = [{transform_indices = @transform_0, window_bounds = array<i64: 1, 8, 32>}, {transform_indices = @transform_1, window_bounds = array<i64: 1, 1, 8>}, {pipeline_mode = #tpu.pipeline_mode<synchronous>, transform_indices = @transform_2, window_bounds = array<i64: 32, 64>}, {pipeline_mode = #tpu.pipeline_mode<synchronous>, transform_indices = @transform_3, window_bounds = array<i64: 32, 64>}, {pipeline_mode = #tpu.pipeline_mode<synchronous>, transform_indices = @transform_4, window_bounds = array<i64: 32, 64>}, {pipeline_mode = #tpu.pipeline_mode<synchronous>, transform_indices = @transform_5, window_bounds = array<i64: 64, 32>}, {pipeline_mode = #tpu.pipeline_mode<synchronous>, transform_indices = @transform_6, window_bounds = array<i64: 2, 16>}, {pipeline_mode = #tpu.pipeline_mode<synchronous>, transform_indices = @transform_7, window_bounds = array<i64: 2, 16>}, {pipeline_mode = #tpu.pipeline_mode<synchronous>, transform_indices = @transform_8, window_bounds = array<i64: 16, 32>}, {pipeline_mode = #tpu.pipeline_mode<synchronous>, transform_indices = @transform_9, window_bounds = array<i64: 1, 32>}, {pipeline_mode = #tpu.pipeline_mode<synchronous>, transform_indices = @transform_10, window_bounds = array<i64: 16, 32>}, {pipeline_mode = #tpu.pipeline_mode<synchronous>, transform_indices = @transform_11, window_bounds = array<i64: 1, 32>}, {pipeline_mode = #tpu.pipeline_mode<synchronous>, transform_indices = @transform_12, window_bounds = array<i64: 32, 16>}, {pipeline_mode = #tpu.pipeline_mode<synchronous>, transform_indices = @transform_13, window_bounds = array<i64: 1, 16>}, {pipeline_mode = #tpu.pipeline_mode<synchronous>, transform_indices = @transform_14, window_bounds = array<i64: 32, 16>}, {pipeline_mode = #tpu.pipeline_mode<synchronous>, transform_indices = @transform_15, window_bounds = array<i64: 1, 16>}, {pipeline_mode = #tpu.pipeline_mode<synchronous>, transform_indices = @transform_16, window_bounds = array<i64: 2, 16>}, {pipeline_mode = #tpu.pipeline_mode<synchronous>, transform_indices = @transform_17, window_bounds = array<i64: 2, 16>}, {transform_indices = @transform_18, window_bounds = array<i64: 1, 8, 32>}]} {
    %c0 = arith.constant 0 : index
    %c0_0 = arith.constant 0 : index
    %c0_1 = arith.constant 0 : index
    %0 = vector.load %arg1[%c0, %c0_0, %c0_1] : memref<1x8x32xf32, #tpu.memory_space<vmem>>, vector<1x8x32xf32>
    %1 = vector.shape_cast %0 : vector<1x8x32xf32> to vector<8x32xf32>
    %c0_2 = arith.constant 0 : index
    %c0_3 = arith.constant 0 : index
    %c0_4 = arith.constant 0 : index
    %2 = vector.load %arg2[%c0_2, %c0_3, %c0_4] : memref<1x1x8xf32, #tpu.memory_space<vmem>>, vector<1x1x8xf32>
    %3 = vector.shape_cast %2 : vector<1x1x8xf32> to vector<1x8xf32>
    %c0_5 = arith.constant 0 : index
    %c0_6 = arith.constant 0 : index
    %4 = vector.load %arg3[%c0_5, %c0_6] : memref<32x64xf32, #tpu.memory_space<vmem>>, vector<32x64xf32>
    %cst = arith.constant dense<0.000000e+00> : vector<8x64xf32>
    %5 = tpu.matmul %1, %4, %cst {dimension_numbers = #tpu.dot_dimension_numbers<[1], [0], [0], [1], [0, 0, 1, 1], [], []>} : vector<8x32xf32>, vector<32x64xf32>, vector<8x64xf32> -> vector<8x64xf32>
    %c0_7 = arith.constant 0 : index
    %c0_8 = arith.constant 0 : index
    %6 = vector.load %arg4[%c0_7, %c0_8] : memref<32x64xf32, #tpu.memory_space<vmem>>, vector<32x64xf32>
    %cst_9 = arith.constant dense<0.000000e+00> : vector<8x64xf32>
    %7 = tpu.matmul %1, %6, %cst_9 {dimension_numbers = #tpu.dot_dimension_numbers<[1], [0], [0], [1], [0, 0, 1, 1], [], []>} : vector<8x32xf32>, vector<32x64xf32>, vector<8x64xf32> -> vector<8x64xf32>
    %c0_10 = arith.constant 0 : index
    %c0_11 = arith.constant 0 : index
    %8 = vector.load %arg5[%c0_10, %c0_11] : memref<32x64xf32, #tpu.memory_space<vmem>>, vector<32x64xf32>
    %cst_12 = arith.constant dense<0.000000e+00> : vector<8x64xf32>
    %9 = tpu.matmul %1, %8, %cst_12 {dimension_numbers = #tpu.dot_dimension_numbers<[1], [0], [0], [1], [0, 0, 1, 1], [], []>} : vector<8x32xf32>, vector<32x64xf32>, vector<8x64xf32> -> vector<8x64xf32>
    %10 = vector.extract_strided_slice %5 {offsets = [0, 0], sizes = [8, 16], strides = [1, 1]} : vector<8x64xf32> to vector<8x16xf32>
    %11 = vector.extract_strided_slice %7 {offsets = [0, 0], sizes = [8, 16], strides = [1, 1]} : vector<8x64xf32> to vector<8x16xf32>
    %cst_13 = arith.constant dense<0.000000e+00> : vector<8x8xf32>
    %12 = tpu.matmul %10, %11, %cst_13 {dimension_numbers = #tpu.dot_dimension_numbers<[1], [1], [0], [0], [0, 0, 1, 0], [], []>} : vector<8x16xf32>, vector<8x16xf32>, vector<8x8xf32> -> vector<8x8xf32>
    %13 = vector.broadcast %3 : vector<1x8xf32> to vector<8x8xf32>
    %14 = arith.addf %12, %13 : vector<8x8xf32>
    %cst_14 = arith.constant dense<0xFF800000> : vector<8xf32>
    %15 = vector.multi_reduction <maximumf>, %14, %cst_14 [1] : vector<8x8xf32> to vector<8xf32>
    %16 = vector.shape_cast %15 : vector<8xf32> to vector<8x1xf32>
    %17 = vector.broadcast %16 : vector<8x1xf32> to vector<8x8xf32>
    %18 = arith.subf %14, %17 : vector<8x8xf32>
    %19 = math.exp %18 : vector<8x8xf32>
    %cst_15 = arith.constant dense<0.000000e+00> : vector<8xf32>
    %20 = vector.multi_reduction <add>, %19, %cst_15 [1] : vector<8x8xf32> to vector<8xf32>
    %21 = vector.shape_cast %20 : vector<8xf32> to vector<8x1xf32>
    %22 = vector.extract_strided_slice %9 {offsets = [0, 0], sizes = [8, 16], strides = [1, 1]} : vector<8x64xf32> to vector<8x16xf32>
    %cst_16 = arith.constant dense<0.000000e+00> : vector<8x16xf32>
    %23 = tpu.matmul %19, %22, %cst_16 {dimension_numbers = #tpu.dot_dimension_numbers<[1], [0], [0], [1], [0, 0, 1, 1], [], []>} : vector<8x8xf32>, vector<8x16xf32>, vector<8x16xf32> -> vector<8x16xf32>
    %cst_17 = arith.constant 1.000000e+00 : f32
    %24 = vector.broadcast %cst_17 : f32 to vector<8x1xf32>
    %25 = arith.divf %24, %21 : vector<8x1xf32>
    %26 = vector.broadcast %25 : vector<8x1xf32> to vector<8x16xf32>
    %27 = arith.mulf %23, %26 : vector<8x16xf32>
    %c0_18 = arith.constant 0 : index
    %c0_19 = arith.constant 0 : index
    %28 = vector.load %arg20[%c0_18, %c0_19] : memref<8x64xf32, #tpu.memory_space<vmem>>, vector<8x16xf32>
    tpu.vector_store %arg20[%c0_18, %c0_19], %27 {strides = array<i32>} : memref<8x64xf32, #tpu.memory_space<vmem>>, vector<8x16xf32>,
    %29 = vector.extract_strided_slice %5 {offsets = [0, 16], sizes = [8, 16], strides = [1, 1]} : vector<8x64xf32> to vector<8x16xf32>
    %30 = vector.extract_strided_slice %7 {offsets = [0, 16], sizes = [8, 16], strides = [1, 1]} : vector<8x64xf32> to vector<8x16xf32>
    %cst_20 = arith.constant dense<0.000000e+00> : vector<8x8xf32>
    %31 = tpu.matmul %29, %30, %cst_20 {dimension_numbers = #tpu.dot_dimension_numbers<[1], [1], [0], [0], [0, 0, 1, 0], [], []>} : vector<8x16xf32>, vector<8x16xf32>, vector<8x8xf32> -> vector<8x8xf32>
    %32 = vector.broadcast %3 : vector<1x8xf32> to vector<8x8xf32>
    %33 = arith.addf %31, %32 : vector<8x8xf32>
    %cst_21 = arith.constant dense<0xFF800000> : vector<8xf32>
    %34 = vector.multi_reduction <maximumf>, %33, %cst_21 [1] : vector<8x8xf32> to vector<8xf32>
    %35 = vector.shape_cast %34 : vector<8xf32> to vector<8x1xf32>
    %36 = vector.broadcast %35 : vector<8x1xf32> to vector<8x8xf32>
    %37 = arith.subf %33, %36 : vector<8x8xf32>
    %38 = math.exp %37 : vector<8x8xf32>
    %cst_22 = arith.constant dense<0.000000e+00> : vector<8xf32>
    %39 = vector.multi_reduction <add>, %38, %cst_22 [1] : vector<8x8xf32> to vector<8xf32>
    %40 = vector.shape_cast %39 : vector<8xf32> to vector<8x1xf32>
    %41 = vector.extract_strided_slice %9 {offsets = [0, 16], sizes = [8, 16], strides = [1, 1]} : vector<8x64xf32> to vector<8x16xf32>
    %cst_23 = arith.constant dense<0.000000e+00> : vector<8x16xf32>
    %42 = tpu.matmul %38, %41, %cst_23 {dimension_numbers = #tpu.dot_dimension_numbers<[1], [0], [0], [1], [0, 0, 1, 1], [], []>} : vector<8x8xf32>, vector<8x16xf32>, vector<8x16xf32> -> vector<8x16xf32>
    %cst_24 = arith.constant 1.000000e+00 : f32
    %43 = vector.broadcast %cst_24 : f32 to vector<8x1xf32>
    %44 = arith.divf %43, %40 : vector<8x1xf32>
    %45 = vector.broadcast %44 : vector<8x1xf32> to vector<8x16xf32>
    %46 = arith.mulf %42, %45 : vector<8x16xf32>
    %c0_25 = arith.constant 0 : index
    %c16 = arith.constant 16 : index
    %47 = vector.load %arg20[%c0_25, %c16] : memref<8x64xf32, #tpu.memory_space<vmem>>, vector<8x16xf32>
    tpu.vector_store %arg20[%c0_25, %c16], %46 {strides = array<i32>} : memref<8x64xf32, #tpu.memory_space<vmem>>, vector<8x16xf32>,
    %48 = vector.extract_strided_slice %5 {offsets = [0, 32], sizes = [8, 16], strides = [1, 1]} : vector<8x64xf32> to vector<8x16xf32>
    %49 = vector.extract_strided_slice %7 {offsets = [0, 32], sizes = [8, 16], strides = [1, 1]} : vector<8x64xf32> to vector<8x16xf32>
    %cst_26 = arith.constant dense<0.000000e+00> : vector<8x8xf32>
    %50 = tpu.matmul %48, %49, %cst_26 {dimension_numbers = #tpu.dot_dimension_numbers<[1], [1], [0], [0], [0, 0, 1, 0], [], []>} : vector<8x16xf32>, vector<8x16xf32>, vector<8x8xf32> -> vector<8x8xf32>
    %51 = vector.broadcast %3 : vector<1x8xf32> to vector<8x8xf32>
    %52 = arith.addf %50, %51 : vector<8x8xf32>
    %cst_27 = arith.constant dense<0xFF800000> : vector<8xf32>
    %53 = vector.multi_reduction <maximumf>, %52, %cst_27 [1] : vector<8x8xf32> to vector<8xf32>
    %54 = vector.shape_cast %53 : vector<8xf32> to vector<8x1xf32>
    %55 = vector.broadcast %54 : vector<8x1xf32> to vector<8x8xf32>
    %56 = arith.subf %52, %55 : vector<8x8xf32>
    %57 = math.exp %56 : vector<8x8xf32>
    %cst_28 = arith.constant dense<0.000000e+00> : vector<8xf32>
    %58 = vector.multi_reduction <add>, %57, %cst_28 [1] : vector<8x8xf32> to vector<8xf32>
    %59 = vector.shape_cast %58 : vector<8xf32> to vector<8x1xf32>
    %60 = vector.extract_strided_slice %9 {offsets = [0, 32], sizes = [8, 16], strides = [1, 1]} : vector<8x64xf32> to vector<8x16xf32>
    %cst_29 = arith.constant dense<0.000000e+00> : vector<8x16xf32>
    %61 = tpu.matmul %57, %60, %cst_29 {dimension_numbers = #tpu.dot_dimension_numbers<[1], [0], [0], [1], [0, 0, 1, 1], [], []>} : vector<8x8xf32>, vector<8x16xf32>, vector<8x16xf32> -> vector<8x16xf32>
    %cst_30 = arith.constant 1.000000e+00 : f32
    %62 = vector.broadcast %cst_30 : f32 to vector<8x1xf32>
    %63 = arith.divf %62, %59 : vector<8x1xf32>
    %64 = vector.broadcast %63 : vector<8x1xf32> to vector<8x16xf32>
    %65 = arith.mulf %61, %64 : vector<8x16xf32>
    %c0_31 = arith.constant 0 : index
    %c32 = arith.constant 32 : index
    %66 = vector.load %arg20[%c0_31, %c32] : memref<8x64xf32, #tpu.memory_space<vmem>>, vector<8x16xf32>
    tpu.vector_store %arg20[%c0_31, %c32], %65 {strides = array<i32>} : memref<8x64xf32, #tpu.memory_space<vmem>>, vector<8x16xf32>,
    %67 = vector.extract_strided_slice %5 {offsets = [0, 48], sizes = [8, 16], strides = [1, 1]} : vector<8x64xf32> to vector<8x16xf32>
    %68 = vector.extract_strided_slice %7 {offsets = [0, 48], sizes = [8, 16], strides = [1, 1]} : vector<8x64xf32> to vector<8x16xf32>
    %cst_32 = arith.constant dense<0.000000e+00> : vector<8x8xf32>
    %69 = tpu.matmul %67, %68, %cst_32 {dimension_numbers = #tpu.dot_dimension_numbers<[1], [1], [0], [0], [0, 0, 1, 0], [], []>} : vector<8x16xf32>, vector<8x16xf32>, vector<8x8xf32> -> vector<8x8xf32>
    %70 = vector.broadcast %3 : vector<1x8xf32> to vector<8x8xf32>
    %71 = arith.addf %69, %70 : vector<8x8xf32>
    %cst_33 = arith.constant dense<0xFF800000> : vector<8xf32>
    %72 = vector.multi_reduction <maximumf>, %71, %cst_33 [1] : vector<8x8xf32> to vector<8xf32>
    %73 = vector.shape_cast %72 : vector<8xf32> to vector<8x1xf32>
    %74 = vector.broadcast %73 : vector<8x1xf32> to vector<8x8xf32>
    %75 = arith.subf %71, %74 : vector<8x8xf32>
    %76 = math.exp %75 : vector<8x8xf32>
    %cst_34 = arith.constant dense<0.000000e+00> : vector<8xf32>
    %77 = vector.multi_reduction <add>, %76, %cst_34 [1] : vector<8x8xf32> to vector<8xf32>
    %78 = vector.shape_cast %77 : vector<8xf32> to vector<8x1xf32>
    %79 = vector.extract_strided_slice %9 {offsets = [0, 48], sizes = [8, 16], strides = [1, 1]} : vector<8x64xf32> to vector<8x16xf32>
    %cst_35 = arith.constant dense<0.000000e+00> : vector<8x16xf32>
    %80 = tpu.matmul %76, %79, %cst_35 {dimension_numbers = #tpu.dot_dimension_numbers<[1], [0], [0], [1], [0, 0, 1, 1], [], []>} : vector<8x8xf32>, vector<8x16xf32>, vector<8x16xf32> -> vector<8x16xf32>
    %cst_36 = arith.constant 1.000000e+00 : f32
    %81 = vector.broadcast %cst_36 : f32 to vector<8x1xf32>
    %82 = arith.divf %81, %78 : vector<8x1xf32>
    %83 = vector.broadcast %82 : vector<8x1xf32> to vector<8x16xf32>
    %84 = arith.mulf %80, %83 : vector<8x16xf32>
    %c0_37 = arith.constant 0 : index
    %c48 = arith.constant 48 : index
    %85 = vector.load %arg20[%c0_37, %c48] : memref<8x64xf32, #tpu.memory_space<vmem>>, vector<8x16xf32>
    tpu.vector_store %arg20[%c0_37, %c48], %84 {strides = array<i32>} : memref<8x64xf32, #tpu.memory_space<vmem>>, vector<8x16xf32>,
    %c0_38 = arith.constant 0 : index
    %c0_39 = arith.constant 0 : index
    %86 = vector.load %arg20[%c0_38, %c0_39] : memref<8x64xf32, #tpu.memory_space<vmem>>, vector<8x64xf32>
    %c0_40 = arith.constant 0 : index
    %c0_41 = arith.constant 0 : index
    %87 = vector.load %arg6[%c0_40, %c0_41] : memref<64x32xf32, #tpu.memory_space<vmem>>, vector<64x32xf32>
    %cst_42 = arith.constant dense<0.000000e+00> : vector<8x32xf32>
    %88 = tpu.matmul %86, %87, %cst_42 {dimension_numbers = #tpu.dot_dimension_numbers<[1], [0], [0], [1], [0, 0, 1, 1], [], []>} : vector<8x64xf32>, vector<64x32xf32>, vector<8x32xf32> -> vector<8x32xf32>
    %89 = vector.extract_strided_slice %1 {offsets = [0, 0], sizes = [8, 16], strides = [1, 1]} : vector<8x32xf32> to vector<8x16xf32>
    %90 = vector.extract_strided_slice %1 {offsets = [0, 16], sizes = [8, 16], strides = [1, 1]} : vector<8x32xf32> to vector<8x16xf32>
    %91 = vector.extract_strided_slice %88 {offsets = [0, 0], sizes = [8, 16], strides = [1, 1]} : vector<8x32xf32> to vector<8x16xf32>
    %92 = arith.addf %89, %91 : vector<8x16xf32>
    %93 = vector.extract_strided_slice %88 {offsets = [0, 16], sizes = [8, 16], strides = [1, 1]} : vector<8x32xf32> to vector<8x16xf32>
    %94 = arith.addf %90, %93 : vector<8x16xf32>
    %c0_43 = arith.constant 0 : index
    %c0_44 = arith.constant 0 : index
    %95 = vector.load %arg7[%c0_43, %c0_44] : memref<2x16xf32, #tpu.memory_space<vmem>>, vector<2x16xf32>
    %c0_45 = arith.constant 0 : index
    %c0_46 = arith.constant 0 : index
    %96 = vector.load %arg8[%c0_45, %c0_46] : memref<2x16xf32, #tpu.memory_space<vmem>>, vector<2x16xf32>
    %cst_47 = arith.constant dense<0.000000e+00> : vector<8xf32>
    %97 = vector.multi_reduction <add>, %92, %cst_47 [1] : vector<8x16xf32> to vector<8xf32>
    %98 = vector.shape_cast %97 : vector<8xf32> to vector<8x1xf32>
    %cst_48 = arith.constant dense<0.000000e+00> : vector<8xf32>
    %99 = vector.multi_reduction <add>, %94, %cst_48 [1] : vector<8x16xf32> to vector<8xf32>
    %100 = vector.shape_cast %99 : vector<8xf32> to vector<8x1xf32>
    %101 = arith.addf %98, %100 : vector<8x1xf32>
    %cst_49 = arith.constant 3.125000e-02 : f32
    %102 = vector.broadcast %cst_49 : f32 to vector<8x1xf32>
    %103 = arith.mulf %101, %102 : vector<8x1xf32>
    %104 = vector.broadcast %103 : vector<8x1xf32> to vector<8x16xf32>
    %105 = arith.subf %92, %104 : vector<8x16xf32>
    %106 = vector.broadcast %103 : vector<8x1xf32> to vector<8x16xf32>
    %107 = arith.subf %94, %106 : vector<8x16xf32>
    %108 = arith.mulf %105, %105 : vector<8x16xf32>
    %cst_50 = arith.constant dense<0.000000e+00> : vector<8xf32>
    %109 = vector.multi_reduction <add>, %108, %cst_50 [1] : vector<8x16xf32> to vector<8xf32>
    %110 = vector.shape_cast %109 : vector<8xf32> to vector<8x1xf32>
    %111 = arith.mulf %107, %107 : vector<8x16xf32>
    %cst_51 = arith.constant dense<0.000000e+00> : vector<8xf32>
    %112 = vector.multi_reduction <add>, %111, %cst_51 [1] : vector<8x16xf32> to vector<8xf32>
    %113 = vector.shape_cast %112 : vector<8xf32> to vector<8x1xf32>
    %114 = arith.addf %110, %113 : vector<8x1xf32>
    %cst_52 = arith.constant 3.125000e-02 : f32
    %115 = vector.broadcast %cst_52 : f32 to vector<8x1xf32>
    %116 = arith.mulf %114, %115 : vector<8x1xf32>
    %cst_53 = arith.constant 9.99999974E-6 : f32
    %117 = vector.broadcast %cst_53 : f32 to vector<8x1xf32>
    %118 = arith.addf %116, %117 : vector<8x1xf32>
    %119 = math.rsqrt %118 : vector<8x1xf32>
    %120 = vector.broadcast %119 : vector<8x1xf32> to vector<8x16xf32>
    %121 = arith.mulf %105, %120 : vector<8x16xf32>
    %122 = vector.extract_strided_slice %95 {offsets = [0, 0], sizes = [1, 16], strides = [1, 1]} : vector<2x16xf32> to vector<1x16xf32>
    %123 = vector.broadcast %122 : vector<1x16xf32> to vector<8x16xf32>
    %124 = arith.mulf %121, %123 : vector<8x16xf32>
    %125 = vector.extract_strided_slice %95 {offsets = [1, 0], sizes = [1, 16], strides = [1, 1]} : vector<2x16xf32> to vector<1x16xf32>
    %126 = vector.broadcast %125 : vector<1x16xf32> to vector<8x16xf32>
    %127 = arith.addf %124, %126 : vector<8x16xf32>
    %128 = vector.broadcast %119 : vector<8x1xf32> to vector<8x16xf32>
    %129 = arith.mulf %107, %128 : vector<8x16xf32>
    %130 = vector.extract_strided_slice %96 {offsets = [0, 0], sizes = [1, 16], strides = [1, 1]} : vector<2x16xf32> to vector<1x16xf32>
    %131 = vector.broadcast %130 : vector<1x16xf32> to vector<8x16xf32>
    %132 = arith.mulf %129, %131 : vector<8x16xf32>
    %133 = vector.extract_strided_slice %96 {offsets = [1, 0], sizes = [1, 16], strides = [1, 1]} : vector<2x16xf32> to vector<1x16xf32>
    %134 = vector.broadcast %133 : vector<1x16xf32> to vector<8x16xf32>
    %135 = arith.addf %132, %134 : vector<8x16xf32>
    %c0_54 = arith.constant 0 : index
    %c0_55 = arith.constant 0 : index
    %136 = vector.load %arg9[%c0_54, %c0_55] : memref<16x32xf32, #tpu.memory_space<vmem>>, vector<16x32xf32>
    %cst_56 = arith.constant dense<0.000000e+00> : vector<8x32xf32>
    %137 = tpu.matmul %127, %136, %cst_56 {dimension_numbers = #tpu.dot_dimension_numbers<[1], [0], [0], [1], [0, 0, 1, 1], [], []>} : vector<8x16xf32>, vector<16x32xf32>, vector<8x32xf32> -> vector<8x32xf32>
    %c0_57 = arith.constant 0 : index
    %c0_58 = arith.constant 0 : index
    %138 = vector.load %arg10[%c0_57, %c0_58] : memref<1x32xf32, #tpu.memory_space<vmem>>, vector<1x32xf32>
    %139 = vector.broadcast %138 : vector<1x32xf32> to vector<8x32xf32>
    %140 = arith.addf %137, %139 : vector<8x32xf32>
    %cst_59 = arith.constant 0.000000e+00 : f32
    %141 = vector.broadcast %cst_59 : f32 to vector<8x32xf32>
    %142 = arith.maximumf %140, %141 : vector<8x32xf32>
    %c0_60 = arith.constant 0 : index
    %c0_61 = arith.constant 0 : index
    %143 = vector.load %arg11[%c0_60, %c0_61] : memref<16x32xf32, #tpu.memory_space<vmem>>, vector<16x32xf32>
    %cst_62 = arith.constant dense<0.000000e+00> : vector<8x32xf32>
    %144 = tpu.matmul %135, %143, %cst_62 {dimension_numbers = #tpu.dot_dimension_numbers<[1], [0], [0], [1], [0, 0, 1, 1], [], []>} : vector<8x16xf32>, vector<16x32xf32>, vector<8x32xf32> -> vector<8x32xf32>
    %c0_63 = arith.constant 0 : index
    %c0_64 = arith.constant 0 : index
    %145 = vector.load %arg12[%c0_63, %c0_64] : memref<1x32xf32, #tpu.memory_space<vmem>>, vector<1x32xf32>
    %146 = vector.broadcast %145 : vector<1x32xf32> to vector<8x32xf32>
    %147 = arith.addf %144, %146 : vector<8x32xf32>
    %cst_65 = arith.constant 0.000000e+00 : f32
    %148 = vector.broadcast %cst_65 : f32 to vector<8x32xf32>
    %149 = arith.maximumf %147, %148 : vector<8x32xf32>
    %c0_66 = arith.constant 0 : index
    %c0_67 = arith.constant 0 : index
    %150 = vector.load %arg13[%c0_66, %c0_67] : memref<32x16xf32, #tpu.memory_space<vmem>>, vector<32x16xf32>
    %cst_68 = arith.constant dense<0.000000e+00> : vector<8x16xf32>
    %151 = tpu.matmul %142, %150, %cst_68 {dimension_numbers = #tpu.dot_dimension_numbers<[1], [0], [0], [1], [0, 0, 1, 1], [], []>} : vector<8x32xf32>, vector<32x16xf32>, vector<8x16xf32> -> vector<8x16xf32>
    %c0_69 = arith.constant 0 : index
    %c0_70 = arith.constant 0 : index
    %152 = vector.load %arg14[%c0_69, %c0_70] : memref<1x16xf32, #tpu.memory_space<vmem>>, vector<1x16xf32>
    %153 = vector.broadcast %152 : vector<1x16xf32> to vector<8x16xf32>
    %154 = arith.addf %151, %153 : vector<8x16xf32>
    %c0_71 = arith.constant 0 : index
    %c0_72 = arith.constant 0 : index
    %155 = vector.load %arg15[%c0_71, %c0_72] : memref<32x16xf32, #tpu.memory_space<vmem>>, vector<32x16xf32>
    %cst_73 = arith.constant dense<0.000000e+00> : vector<8x16xf32>
    %156 = tpu.matmul %149, %155, %cst_73 {dimension_numbers = #tpu.dot_dimension_numbers<[1], [0], [0], [1], [0, 0, 1, 1], [], []>} : vector<8x32xf32>, vector<32x16xf32>, vector<8x16xf32> -> vector<8x16xf32>
    %c0_74 = arith.constant 0 : index
    %c0_75 = arith.constant 0 : index
    %157 = vector.load %arg16[%c0_74, %c0_75] : memref<1x16xf32, #tpu.memory_space<vmem>>, vector<1x16xf32>
    %158 = vector.broadcast %157 : vector<1x16xf32> to vector<8x16xf32>
    %159 = arith.addf %156, %158 : vector<8x16xf32>
    %160 = arith.addf %127, %154 : vector<8x16xf32>
    %161 = arith.addf %135, %159 : vector<8x16xf32>
    %c0_76 = arith.constant 0 : index
    %c0_77 = arith.constant 0 : index
    %162 = vector.load %arg17[%c0_76, %c0_77] : memref<2x16xf32, #tpu.memory_space<vmem>>, vector<2x16xf32>
    %c0_78 = arith.constant 0 : index
    %c0_79 = arith.constant 0 : index
    %163 = vector.load %arg18[%c0_78, %c0_79] : memref<2x16xf32, #tpu.memory_space<vmem>>, vector<2x16xf32>
    %cst_80 = arith.constant dense<0.000000e+00> : vector<8xf32>
    %164 = vector.multi_reduction <add>, %160, %cst_80 [1] : vector<8x16xf32> to vector<8xf32>
    %165 = vector.shape_cast %164 : vector<8xf32> to vector<8x1xf32>
    %cst_81 = arith.constant dense<0.000000e+00> : vector<8xf32>
    %166 = vector.multi_reduction <add>, %161, %cst_81 [1] : vector<8x16xf32> to vector<8xf32>
    %167 = vector.shape_cast %166 : vector<8xf32> to vector<8x1xf32>
    %168 = arith.addf %165, %167 : vector<8x1xf32>
    %cst_82 = arith.constant 3.125000e-02 : f32
    %169 = vector.broadcast %cst_82 : f32 to vector<8x1xf32>
    %170 = arith.mulf %168, %169 : vector<8x1xf32>
    %171 = vector.broadcast %170 : vector<8x1xf32> to vector<8x16xf32>
    %172 = arith.subf %160, %171 : vector<8x16xf32>
    %173 = vector.broadcast %170 : vector<8x1xf32> to vector<8x16xf32>
    %174 = arith.subf %161, %173 : vector<8x16xf32>
    %175 = arith.mulf %172, %172 : vector<8x16xf32>
    %cst_83 = arith.constant dense<0.000000e+00> : vector<8xf32>
    %176 = vector.multi_reduction <add>, %175, %cst_83 [1] : vector<8x16xf32> to vector<8xf32>
    %177 = vector.shape_cast %176 : vector<8xf32> to vector<8x1xf32>
    %178 = arith.mulf %174, %174 : vector<8x16xf32>
    %cst_84 = arith.constant dense<0.000000e+00> : vector<8xf32>
    %179 = vector.multi_reduction <add>, %178, %cst_84 [1] : vector<8x16xf32> to vector<8xf32>
    %180 = vector.shape_cast %179 : vector<8xf32> to vector<8x1xf32>
    %181 = arith.addf %177, %180 : vector<8x1xf32>
    %cst_85 = arith.constant 3.125000e-02 : f32
    %182 = vector.broadcast %cst_85 : f32 to vector<8x1xf32>
    %183 = arith.mulf %181, %182 : vector<8x1xf32>
    %cst_86 = arith.constant 9.99999974E-6 : f32
    %184 = vector.broadcast %cst_86 : f32 to vector<8x1xf32>
    %185 = arith.addf %183, %184 : vector<8x1xf32>
    %186 = math.rsqrt %185 : vector<8x1xf32>
    %187 = vector.broadcast %186 : vector<8x1xf32> to vector<8x16xf32>
    %188 = arith.mulf %172, %187 : vector<8x16xf32>
    %189 = vector.extract_strided_slice %162 {offsets = [0, 0], sizes = [1, 16], strides = [1, 1]} : vector<2x16xf32> to vector<1x16xf32>
    %190 = vector.broadcast %189 : vector<1x16xf32> to vector<8x16xf32>
    %191 = arith.mulf %188, %190 : vector<8x16xf32>
    %192 = vector.extract_strided_slice %162 {offsets = [1, 0], sizes = [1, 16], strides = [1, 1]} : vector<2x16xf32> to vector<1x16xf32>
    %193 = vector.broadcast %192 : vector<1x16xf32> to vector<8x16xf32>
    %194 = arith.addf %191, %193 : vector<8x16xf32>
    %195 = vector.broadcast %186 : vector<8x1xf32> to vector<8x16xf32>
    %196 = arith.mulf %174, %195 : vector<8x16xf32>
    %197 = vector.extract_strided_slice %163 {offsets = [0, 0], sizes = [1, 16], strides = [1, 1]} : vector<2x16xf32> to vector<1x16xf32>
    %198 = vector.broadcast %197 : vector<1x16xf32> to vector<8x16xf32>
    %199 = arith.mulf %196, %198 : vector<8x16xf32>
    %200 = vector.extract_strided_slice %163 {offsets = [1, 0], sizes = [1, 16], strides = [1, 1]} : vector<2x16xf32> to vector<1x16xf32>
    %201 = vector.broadcast %200 : vector<1x16xf32> to vector<8x16xf32>
    %202 = arith.addf %199, %201 : vector<8x16xf32>
    %c0_87 = arith.constant 0 : index
    %c0_88 = arith.constant 0 : index
    %c0_89 = arith.constant 0 : index
    %203 = vector.load %arg19[%c0_87, %c0_88, %c0_89] : memref<1x8x32xf32, #tpu.memory_space<vmem>>, vector<1x8x16xf32>
    %204 = vector.shape_cast %203 : vector<1x8x16xf32> to vector<8x16xf32>
    %205 = vector.shape_cast %194 : vector<8x16xf32> to vector<1x8x16xf32>
    tpu.vector_store %arg19[%c0_87, %c0_88, %c0_89], %205 {strides = array<i32>} : memref<1x8x32xf32, #tpu.memory_space<vmem>>, vector<1x8x16xf32>,
    %c0_90 = arith.constant 0 : index
    %c0_91 = arith.constant 0 : index
    %c16_92 = arith.constant 16 : index
    %206 = vector.load %arg19[%c0_90, %c0_91, %c16_92] : memref<1x8x32xf32, #tpu.memory_space<vmem>>, vector<1x8x16xf32>
    %207 = vector.shape_cast %206 : vector<1x8x16xf32> to vector<8x16xf32>
    %208 = vector.shape_cast %202 : vector<8x16xf32> to vector<1x8x16xf32>
    tpu.vector_store %arg19[%c0_90, %c0_91, %c16_92], %208 {strides = array<i32>} : memref<1x8x32xf32, #tpu.memory_space<vmem>>, vector<1x8x16xf32>,
    return
  }
  func.func @transform_0(%arg0: i32) -> (i32, i32, i32) {
    %c0_i32 = arith.constant 0 : i32
    %c0_i32_0 = arith.constant 0 : i32
    %c0_i32_1 = arith.constant 0 : i32
    return %arg0, %c0_i32, %c0_i32_0 : i32, i32, i32
  }
  func.func @transform_1(%arg0: i32) -> (i32, i32, i32) {
    %c0_i32 = arith.constant 0 : i32
    %c0_i32_0 = arith.constant 0 : i32
    %c0_i32_1 = arith.constant 0 : i32
    return %arg0, %c0_i32, %c0_i32_0 : i32, i32, i32
  }
  func.func @transform_2(%arg0: i32) -> (i32, i32) {
    %c0_i32 = arith.constant 0 : i32
    %c0_i32_0 = arith.constant 0 : i32
    %c0_i32_1 = arith.constant 0 : i32
    return %c0_i32, %c0_i32_0 : i32, i32
  }
  func.func @transform_3(%arg0: i32) -> (i32, i32) {
    %c0_i32 = arith.constant 0 : i32
    %c0_i32_0 = arith.constant 0 : i32
    %c0_i32_1 = arith.constant 0 : i32
    return %c0_i32, %c0_i32_0 : i32, i32
  }
  func.func @transform_4(%arg0: i32) -> (i32, i32) {
    %c0_i32 = arith.constant 0 : i32
    %c0_i32_0 = arith.constant 0 : i32
    %c0_i32_1 = arith.constant 0 : i32
    return %c0_i32, %c0_i32_0 : i32, i32
  }
  func.func @transform_5(%arg0: i32) -> (i32, i32) {
    %c0_i32 = arith.constant 0 : i32
    %c0_i32_0 = arith.constant 0 : i32
    %c0_i32_1 = arith.constant 0 : i32
    return %c0_i32, %c0_i32_0 : i32, i32
  }
  func.func @transform_6(%arg0: i32) -> (i32, i32) {
    %c0_i32 = arith.constant 0 : i32
    %c0_i32_0 = arith.constant 0 : i32
    %c0_i32_1 = arith.constant 0 : i32
    return %c0_i32, %c0_i32_0 : i32, i32
  }
  func.func @transform_7(%arg0: i32) -> (i32, i32) {
    %c0_i32 = arith.constant 0 : i32
    %c0_i32_0 = arith.constant 0 : i32
    %c0_i32_1 = arith.constant 0 : i32
    return %c0_i32, %c0_i32_0 : i32, i32
  }
  func.func @transform_8(%arg0: i32) -> (i32, i32) {
    %c0_i32 = arith.constant 0 : i32
    %c0_i32_0 = arith.constant 0 : i32
    %c0_i32_1 = arith.constant 0 : i32
    return %c0_i32, %c0_i32_0 : i32, i32
  }
  func.func @transform_9(%arg0: i32) -> (i32, i32) {
    %c0_i32 = arith.constant 0 : i32
    %c0_i32_0 = arith.constant 0 : i32
    %c0_i32_1 = arith.constant 0 : i32
    return %c0_i32, %c0_i32_0 : i32, i32
  }
  func.func @transform_10(%arg0: i32) -> (i32, i32) {
    %c0_i32 = arith.constant 0 : i32
    %c0_i32_0 = arith.constant 0 : i32
    %c0_i32_1 = arith.constant 0 : i32
    return %c0_i32, %c0_i32_0 : i32, i32
  }
  func.func @transform_11(%arg0: i32) -> (i32, i32) {
    %c0_i32 = arith.constant 0 : i32
    %c0_i32_0 = arith.constant 0 : i32
    %c0_i32_1 = arith.constant 0 : i32
    return %c0_i32, %c0_i32_0 : i32, i32
  }
  func.func @transform_12(%arg0: i32) -> (i32, i32) {
    %c0_i32 = arith.constant 0 : i32
    %c0_i32_0 = arith.constant 0 : i32
    %c0_i32_1 = arith.constant 0 : i32
    return %c0_i32, %c0_i32_0 : i32, i32
  }
  func.func @transform_13(%arg0: i32) -> (i32, i32) {
    %c0_i32 = arith.constant 0 : i32
    %c0_i32_0 = arith.constant 0 : i32
    %c0_i32_1 = arith.constant 0 : i32
    return %c0_i32, %c0_i32_0 : i32, i32
  }
  func.func @transform_14(%arg0: i32) -> (i32, i32) {
    %c0_i32 = arith.constant 0 : i32
    %c0_i32_0 = arith.constant 0 : i32
    %c0_i32_1 = arith.constant 0 : i32
    return %c0_i32, %c0_i32_0 : i32, i32
  }
  func.func @transform_15(%arg0: i32) -> (i32, i32) {
    %c0_i32 = arith.constant 0 : i32
    %c0_i32_0 = arith.constant 0 : i32
    %c0_i32_1 = arith.constant 0 : i32
    return %c0_i32, %c0_i32_0 : i32, i32
  }
  func.func @transform_16(%arg0: i32) -> (i32, i32) {
    %c0_i32 = arith.constant 0 : i32
    %c0_i32_0 = arith.constant 0 : i32
    %c0_i32_1 = arith.constant 0 : i32
    return %c0_i32, %c0_i32_0 : i32, i32
  }
  func.func @transform_17(%arg0: i32) -> (i32, i32) {
    %c0_i32 = arith.constant 0 : i32
    %c0_i32_0 = arith.constant 0 : i32
    %c0_i32_1 = arith.constant 0 : i32
    return %c0_i32, %c0_i32_0 : i32, i32
  }
  func.func @transform_18(%arg0: i32) -> (i32, i32, i32) {
    %c0_i32 = arith.constant 0 : i32
    %c0_i32_0 = arith.constant 0 : i32
    %c0_i32_1 = arith.constant 0 : i32
    return %arg0, %c0_i32, %c0_i32_0 : i32, i32, i32
  }
}

</mosaic_0001>

<bundles_post_ra>
// kernel: tpu_custom_call.1
= control target key start
LH: loop header
LB: loop body
LE: loop exit
PB: predicated region body
PF: predicated region fallthrough
CT: control target
= control target key end

     0   :  { %s2992_s0 = inlined_call_operand.vmem [shape: f32[2,8,32], index: 0, kind: input, shape index: {}]   ;;  %s2993_s1 = inlined_call_operand.vmem [shape: f32[2,1,8], index: 1, kind: input, shape index: {}]   ;;  %s2994_s2 = inlined_call_operand.vmem [shape: f32[32,64], index: 2, kind: input, shape index: {}]   ;;  %s2995_s3 = inlined_call_operand.vmem [shape: f32[32,64], index: 3, kind: input, shape index: {}]   ;;  %s2996_s4 = inlined_call_operand.vmem [shape: f32[32,64], index: 4, kind: input, shape index: {}]   ;;  %s2997_s5 = inlined_call_operand.vmem [shape: f32[64,32], index: 5, kind: input, shape index: {}]   ;;  %s2998_s6 = inlined_call_operand.vmem [shape: f32[2,16], index: 6, kind: input, shape index: {}]   ;;  %s2999_s7 = inlined_call_operand.vmem [shape: f32[2,16], index: 7, kind: input, shape index: {}]   ;;  %s3000_s8 = inlined_call_operand.vmem [shape: f32[16,32], index: 8, kind: input, shape index: {}]   ;;  %s3001_s9 = inlined_call_operand.vmem [shape: f32[1,32], index: 9, kind: input, shape index: {}]   ;;  %s3002_s10 = inlined_call_operand.vmem [shape: f32[16,32], index: 10, kind: input, shape index: {}]   ;;  %s3003_s11 = inlined_call_operand.vmem [shape: f32[1,32], index: 11, kind: input, shape index: {}]   ;;  %s3004_s12 = inlined_call_operand.vmem [shape: f32[32,16], index: 12, kind: input, shape index: {}]   ;;  %s3005_s13 = inlined_call_operand.vmem [shape: f32[1,16], index: 13, kind: input, shape index: {}]   ;;  %s3006_s14 = inlined_call_operand.vmem [shape: f32[32,16], index: 14, kind: input, shape index: {}]   ;;  %s3007_s15 = inlined_call_operand.vmem [shape: f32[1,16], index: 15, kind: input, shape index: {}]   ;;  %s3008_s16 = inlined_call_operand.vmem [shape: f32[2,16], index: 16, kind: input, shape index: {}]   ;;  %s3009_s17 = inlined_call_operand.vmem [shape: f32[2,16], index: 17, kind: input, shape index: {}]   ;;  %s3010_s18 = inlined_call_operand.hbm [shape: f32[2,8,32], index: 18, kind: output, shape index: {}]  }
   0x1   :  { %3019 = sst [smem:[#allocation11_spill]] %s2992_s0 }
   0x2   :  { %3020 = sst [smem:[#allocation12_spill]] %s2993_s1 }
   0x3   :  { %3021 = sst [smem:[#allocation13_spill]] %s2994_s2 }
   0x4   :  { %23 = vsyncpa [#allocation4], 0 }
   0x5   :  { %25 = vsyncpa [#allocation4 + $0x1], 0  ;;  %s2635_s27 = smov 0   ;;  %s2637_s28 = smov 0  }
   0x6   :  { %s2639_s29 = smov 0   ;;  %s2641_s30 = smov 0  }
   0x7 LB: > { %3022 = sst [smem:[#allocation6_spill]] %s2516_s27  ;;  %s2656_s0 = sadd.s32 4294967295, %s2528_s30   ;;  %s2528_s30 = sphi %s2641_s30, %s3035_s30   ;;  %s2524_s29 = sphi %s2639_s29, %s3037_s29   ;;  %s2520_s28 = sphi %s2637_s28, %s3039_s28   ;;  %s2516_s27 = sphi %s2635_s27, %s3038_s27  }
   0x8   : > { %3023 = sst [smem:[#allocation7_spill]] %s2524_s29  ;;  %s2131_s19 = sadd.s32 4294967294, %s2528_s30  }
   0x9   : > { %s2660_s1 = sadd.s32 1, %s2528_s30   ;;  %s426_s20 = sadd.s32 1, %s2524_s29 }
   0xa   : > { %3024 = sst [smem:[#allocation8_spill]] %s2660_s1  ;;  %s423_s21 = ssub.s32 %s2528_s30, %s2660_s1 }
   0xb   : > { %p436_p0 = scmp.ne.s32.totalorder %s2524_s29, %s2520_s28  ;;  %p424_p1 = scmp.eq.s32.totalorder %s423_s21, 0 }
   0xc   : > { %p437_p2 = scmp.eq.s32.totalorder %s2656_s0, 1  ;;  %p442_p3 = scmp.ne.s32.totalorder %s2520_s28, %s2516_s27 }
   0xd   : > { %p443_p4 = scmp.eq.s32.totalorder %s2131_s19, 1  ;;  %p2134_p7 = scmp.ge.s32.totalorder %s2528_s30, 1 }
   0xe   : > { %s2671_s22 = scalar_select %p424_p1, %s2524_s29, %s426_s20  }
   0xf   : > { %p2673_p5 = por %p437_p2, %p436_p0  ;;  %p2677_p6 = por %p443_p4, %p442_p3 }
  0x10   : > { %3025 = sst [smem:[#allocation9_spill]] %s2671_s22  ;;  %p522_p8 = scmp.lt.s32.totalorder %s2528_s30, 3 }
  0x11   : > { %s3027_s23 = scalar_select %p2677_p6, 1, 0 }
  0x12   : > { %p523_p9 = pnand %p2134_p7, %p522_p8 }
  0x13   : > { %3028 = sst [smem:[#allocation10_spill]] %s3027_s23  ;;  %s3029_s26 = sld [smem:[#allocation13_spill]] (!%p523_p9)  ;;  %v665_v2 = vld [vmem:[%s2995_s3] sm:$0xff] (!%p523_p9)  ;;  %v2530_v3 = vmov (!%p523_p9), 0.0|0.0   ;;  %v666_v5 = vld [vmem:[%s2995_s3 + $0x8] sm:$0xff] (!%p523_p9)  ;;  %v667_v9 = vld [vmem:[%s2995_s3 + $0x10] sm:$0xff] (!%p523_p9) }
  0x14   : > { %526 = sbr.rel (%p523_p9) target bundleno = 3325 (0xcfd), region = 92  ;;  %2350 = vmatprep.subr.bf16.mxu0 (!%p523_p9), %v2530_v3  ;;  %2356 = vmatprep.subr.bf16.mxu1 (!%p523_p9), %v2530_v3  ;;  %p578_p10 = scmp.lt.s32.totalorder (!%p523_p9), %s2656_s0, 1  ;;  %v2357_v8 = vpack.c.bf16 (!%p523_p9), %v666_v5, %v665_v2  ;;  %v668_v10 = vld [vmem:[%s2995_s3 + $0x18] sm:$0xff] (!%p523_p9)  ;;  %vm2531_vm0 = vmmov (!%p523_p9), 0   ;;  %v2532_v11 = vmov (!%p523_p9), 0.0   ;;  %vm591_vm1 = vcmask (!%p523_p9), 261120  }
  0x15   : > { %2230 = vmatprep.mubr.msk.f32.mxu0 (!%p523_p9), %vm2531_vm0, %v2532_v11  ;;  %2241 = vmatprep.mubr.msk.f32.mxu1 (!%p523_p9), %vm2531_vm0, %v2532_v11  ;;  %v2360_v13 = vpack.c.bf16 (!%p523_p9), %v668_v10, %v667_v9  ;;  %s3030_s24 = sld [smem:[#allocation11_spill]] (!%p523_p9)  ;;  %v739_v15 = vld [vmem:[%s2996_s4] sm:$0xff] (!%p523_p9)  ;;  %v740_v16 = vld [vmem:[%s2996_s4 + $0x8] sm:$0xff] (!%p523_p9)  ;;  %v741_v17 = vld [vmem:[%s2996_s4 + $0x10] sm:$0xff] (!%p523_p9)  ;;  %vm819_vm2 = vcmask (!%p523_p9), 130048   ;;  %s2534_s19 = smov (!%p523_p9), 96  }
  0x16   : > { %2358 = vmatpush3.bf16.msra.mxu1 (!%p523_p9), %v2357_v8  ;;  %v2363_v18 = vpack.c.bf16 (!%p523_p9), %v740_v16, %v739_v15  ;;  %v742_v19 = vld [vmem:[%s2996_s4 + $0x18] sm:$0xff] (!%p523_p9)  ;;  %s2535_s20 = smov (!%p523_p9), 80   ;;  %vm896_vm3 = vcmask (!%p523_p9), 64512   ;;  %vm1154_vm4 = vcmask (!%p523_p9), 261248   ;;  %vm1326_vm5 = vcmask (!%p523_p9), 392448   ;;  %s575_s22 = sand.u32 (!%p523_p9), 1, %s2520_s28  }
  0x17   : > { %2359 = vmatprep.subr.bf16.mxu1 (!%p523_p9), %v2530_v3  ;;  %v2366_v20 = vpack.c.bf16 (!%p523_p9), %v742_v19, %v741_v17  ;;  %v1501_v19 = vld [vmem:[%s2997_s5] sm:$0xff] (!%p523_p9)  ;;  %vm1498_vm6 = vcmask (!%p523_p9), 523648   ;;  %vm1509_vm7 = vcmask (!%p523_p9), 523264   ;;  %s2050_s21 = scalar_lea.sflag (!%p523_p9), [#allocation4], %s575_s22 }
  0x19   : > { %v587_v0 = vld [vmem:[%s3029_s26] sm:$0xff] (!%p523_p9)  ;;  %v588_v1 = vld [vmem:[%s3029_s26 + $0x8] sm:$0xff] (!%p523_p9)  ;;  %v589_v6 = vld [vmem:[%s3029_s26 + $0x10] sm:$0xff] (!%p523_p9) }
  0x1a   : > { %v2351_v4 = vpack.c.bf16 (!%p523_p9), %v588_v1, %v587_v0  ;;  %v590_v7 = vld [vmem:[%s3029_s26 + $0x18] sm:$0xff] (!%p523_p9)  ;;  %2361 = vmatpush3.bf16.msra.mxu1 (!%p523_p9), %v2360_v13 }
  0x1b   : > { %v2354_v12 = vpack.c.bf16 %v590_v7, %v589_v6  ;;  %s2715_s29 = scalar_select %p578_p10, %s2656_s0, 1  ;;  %2255 = vmatprep.subr.mxu1 %v2532_v11 }
  0x1c   : > { %2352 = vmatpush3.bf16.msra.mxu0 %v2351_v4 }
  0x1d   : > { %2353 = vmatprep.subr.bf16.mxu0 %v2530_v3  ;;  %s2136_s27 = sshll.u32 %s2715_s29, 3 }
  0x1e   : > { %s581_s25 = scalar_lea.vmem %s3030_s24, %s2136_s27  ;;  %s3031_s27 = sld [smem:[#allocation12_spill]] }
  0x1f   : > { %v2723_v14 = vld [vmem:[%s581_s25] sm:$0xff]  ;;  %s3017_s25 = smov 112   ;;  %s3032_s24 = smov 112  }
  0x20   : > { %2355 = vmatpush3.bf16.msra.mxu0 %v2354_v12  ;;  %2242 = vmatmul.mubr.msk.f32.vlgmr.msra.gmra.mrb[0].mxu1 %vm591_vm1, %v2723_v14 }
  0x21   : > { %2362 = vmatprep.subr.bf16.mxu0 %v2530_v3  ;;  %2257 = vmatprep.mubr.msk.f32.mxu1 %vm2531_vm0, %v2532_v11 }
  0x23   : > { %2231 = vmatmul.mubr.msk.f32.vlgmr.msra.gmra.mrb[0].mxu0 %vm591_vm1, %v2723_v14 }
  0x24   : > { %2252 = vmatprep.mubr.msk.f32.mxu0 %vm2531_vm0, %v2532_v11  ;;  %2364 = vmatpush3.bf16.msra.mxu0 %v2363_v18  ;;  %s584_s1 = scalar_lea.vmem %s3031_s27, %s2715_s29  ;;  %s2536_s27 = smov 16  }
  0x25   : > { %2365 = vmatprep.subr.bf16.mxu0 %v2530_v3  ;;  %v2140_v32 = vld [vmem:[%s584_s1] ss:$0 sm:$0xff]  ;;  %s2537_s1 = smov 32   ;;  %s2538_s29 = smov 48  }
  0x28   : > { %2367 = vmatpush3.bf16.msra.mxu0 %v2366_v20  ;;  %v1502_v20 = vld [vmem:[%s2997_s5 + $0x8] sm:$0xff] }
  0x29   : > { %2275 = vmatprep.subr.mxu0 %v2532_v11 }
  0x2b   : > { %2253 = vmatmul.mubr.msk.f32.vlgmr.msra.gmra.mrb[2].mxu0 %vm591_vm1, %v2723_v14 }
  0x2c   : > { %2277 = vmatprep.mubr.msk.f32.mxu0 %vm2531_vm0, %v2532_v11 }
  0xf3   : > { %v735_v22 = vpop.f32.mrb[0].mxu1 }
  0xf4   : > { %v2243_v24 = vpop.f32.mrb[1].mxu1  ;;  %2256 = vmatpush3.xpose.msk.msra.mxu1 %vm819_vm2, %v735_v22 }
  0xf5   : > { %2260 = vmatprep.subr.mxu1 %v2532_v11  ;;  %v1504_v24 = vld [vmem:[%s2997_s5 + $0x18] sm:$0xff] }
  0xf6   : > { %v661_v21 = vpop.f32.mrb[0].mxu0 }
  0xf7   : > { %983 = vrot.lane.b32.xlu1 %v661_v21, %s3017_s25  ;;  %v2232_v23 = vpop.f32.mrb[1].mxu0  ;;  %2258 = vmatmul.mubr.msk.f32.vlgmr.msra.gmra.mrb[2].mxu1 %vm819_vm2, %v661_v21 }
  0xf8   : > { %2262 = vmatprep.mubr.msk.f32.mxu1 %vm2531_vm0, %v2532_v11  ;;  %v1503_v23 = vld [vmem:[%s2997_s5 + $0x10] sm:$0xff] }
  0xfb   : > { %1158 = vrot.lane.b32.xlu1 %v735_v22, %s2534_s19 }
  0xfe   : > { %v809_v25 = vpop.f32.mrb[2].mxu0 }
  0xff   : > { %1156 = vrot.lane.b32.xlu1 %v661_v21, %s2534_s19  ;;  %v2254_v27 = vpop.f32.mrb[3].mxu0  ;;  %2261 = vmatpush3.msra.mxu1 %v809_v25 }
 0x100   : > { %2265 = vmatprep.subr.mxu1 %v2532_v11  ;;  %v1506_v27 = vld [vmem:[%s2997_s5 + $0x28] sm:$0xff] }
 0x103   : > { %1330 = vrot.lane.b32.xlu1 %v735_v22, %s2535_s20 }
 0x107   : > { %1328 = vrot.lane.b32.xlu1 %v661_v21, %s2535_s20  ;;  %v2369_v21 = vpack.c.bf16 %v1502_v20, %v1501_v19 }
 0x10b   : > { %1243 = vrot.lane.b32.xlu1 %v809_v25, %s2534_s19 }
 0x169   : > { %v984_v26 = vpop.permute.xlu1 %983 }
 0x16d   : > { %v1159_v28 = vpop.permute.xlu1 %1158 }
 0x16e   : > { %2276 = vmatpush3.xpose.msk.msra.mxu0 %vm819_vm2, %v1159_v28 }
 0x16f   : > { %2285 = vmatprep.subr.mxu0 %v2532_v11 }
 0x171   : > { %v1157_v29 = vpop.permute.xlu1 %1156 }
 0x172   : > { %2278 = vmatmul.mubr.msk.f32.vlgmr.msra.gmra.mrb[4].mxu0 %vm819_vm2, %v1157_v29  ;;  %v1507_v29 = vld [vmem:[%s2997_s5 + $0x30] sm:$0xff] }
 0x173   : > { %2287 = vmatprep.mubr.msk.f32.mxu0 %vm2531_vm0, %v2532_v11 }
 0x175   : > { %v1331_v30 = vpop.permute.xlu1 %1330 }
 0x176   : > { %2286 = vmatpush3.xpose.msk.msra.mxu0 %vm819_vm2, %v1331_v30  ;;  %v1508_v30 = vld [vmem:[%s2997_s5 + $0x38] sm:$0xff] }
 0x177   : > { %2368 = vmatprep.subr.bf16.mxu0 %v2530_v3 }
 0x179   : > { %v1329_v31 = vpop.permute.xlu1 %1328 }
 0x17a   : > { %2288 = vmatmul.mubr.msk.f32.vlgmr.msra.gmra.mrb[6].mxu0 %vm819_vm2, %v1329_v31 }
 0x17b   : > { %2311 = vmatprep.mubr.msk.f32.mxu0 %vm2531_vm0, %v2532_v11  ;;  %2370 = vmatpush3.bf16.msra.mxu0 %v2369_v21 }
 0x17c   : > { %2371 = vmatprep.subr.bf16.mxu0 %v2530_v3 }
 0x17d   : > { %v1244_v62 = vpop.permute.xlu1 %1243 }
 0x1ca   : > { %v892_v33 = vpop.f32.mrb[2].mxu1 }
 0x1cb   : > { %v893_v34 = vadd.f32 %v2140_v32, %v892_v33  ;;  %v2259_v35 = vpop.f32.mrb[3].mxu1  ;;  %v2378_v33 = vpack.c.bf16 %v1508_v30, %v1507_v29  ;;  %v1895_v30 = vld [vmem:[%s3006_s14] sm:$0xff] }
 0x1cd   : > { %v897_v36 = vsel %vm896_vm3, %v893_v34, -inf }
 0x1ce   : > { %898 = vmax.xlane.f32.xlu0 %v897_v36 }
 0x1e4   : > { %985 = vrot.lane.b32.xlu0 %v735_v22, %s3017_s25 }
 0x245   : > { %v1230_v37 = vpop.f32.mrb[4].mxu0 }
 0x246   : > { %v1231_v38 = vadd.f32 %v2140_v32, %v1230_v37  ;;  %v2279_v39 = vpop.f32.mrb[5].mxu0 }
 0x248   : > { %v1234_v40 = vsel %vm896_vm3, %v1231_v38, -inf }
 0x249   : > { %1235 = vmax.xlane.f32.xlu0 %v1234_v40 }
 0x24d   : > { %v1402_v41 = vpop.f32.mrb[6].mxu0 }
 0x24e   : > { %v1403_v42 = vadd.f32 %v2140_v32, %v1402_v41  ;;  %v2289_v43 = vpop.f32.mrb[7].mxu0 }
 0x250   : > { %v1406_v44 = vsel %vm896_vm3, %v1403_v42, -inf }
 0x251   : > { %1407 = vmax.xlane.f32.xlu1 %v1406_v44 }
 0x25b   : > { %v899_v45 = vpop.xlane.xlu0 %898 }
 0x25c   : > { %v900_v46 = vsub.f32 %v893_v34, %v899_v45 }
 0x25e   : > { %v901_v47 = vmul.f32 1.442695, %v900_v46 }
 0x25f   : > { %1071 = vrot.lane.b32.xlu0 %v809_v25, %s3017_s25  ;;  %v986_v49 = vpop.permute.xlu0 %985 }
 0x260   : > { %2446 = vpow2.f32 %v901_v47 }
 0x26a   : > { %v2447_v48 = vpop.eup %2446 }
 0x26b   : > { %2263 = vmatmul.mubr.msk.f32.vlgmr.msra.gmra.mrb[4].mxu1 %vm896_vm3, %v2447_v48  ;;  %v903_v12 = vsel %vm896_vm3, %v2447_v48, 0.0 }
 0x26c   : > { %2266 = vmatpush3.xpose.msk.msra.mxu1 %vm819_vm2, %v986_v49  ;;  %2267 = vmatprep.mubr.msk.f32.mxu1 %vm2531_vm0, %v2532_v11 }
 0x26d   : > { %2270 = vmatprep.subr.mxu1 %v2532_v11 }
 0x26f   : > { %2268 = vmatmul.mubr.msk.f32.vlgmr.msra.gmra.mrb[6].mxu1 %vm819_vm2, %v984_v26  ;;  %v1505_v26 = vld [vmem:[%s2997_s5 + $0x20] sm:$0xff] }
 0x270   : > { %2272 = vmatprep.mubr.msk.f32.mxu1 %vm2531_vm0, %v2532_v11  ;;  %v2375_v28 = vpack.c.bf16 %v1506_v27, %v1505_v26 }
 0x2d6   : > { %v1236_v50 = vpop.xlane.xlu0 %1235 }
 0x2d7   : > { %v1237_v58 = vsub.f32 %v1231_v38, %v1236_v50 }
 0x2d9   : > { %v1238_v59 = vmul.f32 1.442695, %v1237_v58 }
 0x2da   : > { %v1072_v51 = vpop.permute.xlu0 %1071 }
 0x2db   : > { %2271 = vmatpush3.msra.mxu1 %v1072_v51  ;;  %2448 = vpow2.f32 %v1238_v59 }
 0x2dc   : > { %2280 = vmatprep.subr.mxu1 %v2532_v11 }
 0x2de   : > { %v1408_v63 = vpop.xlane.xlu1 %1407 }
 0x2df   : > { %v1409_v0 = vsub.f32 %v1403_v42, %v1408_v63  ;;  %v1585_v63 = vld [vmem:[%s2999_s7] sm:$0x3] }
 0x2e1   : > { %v1410_v4 = vmul.f32 1.442695, %v1409_v0 }
 0x2e5   : > { %v2449_v60 = vpop.eup %2448 }
 0x2e6   : > { %v1240_v61 = vsel %vm896_vm3, %v2449_v60, 0.0 }
 0x33e   : > { %v975_v52 = vpop.f32.mrb[4].mxu1 }
 0x33f   : > { %v2264_v53 = vpop.f32.mrb[5].mxu1 }
 0x342   : > { %v1057_v54 = vpop.f32.mrb[6].mxu1 }
 0x343   : > { %v1058_v55 = vadd.f32 %v2140_v32, %v1057_v54  ;;  %v2269_v56 = vpop.f32.mrb[7].mxu1 }
 0x345   : > { %v1061_v57 = vsel %vm896_vm3, %v1058_v55, -inf }
 0x346   : > { %1062 = vmax.xlane.f32.xlu1 %v1061_v57 }
 0x357   : > { %1415 = vrot.lane.b32.xlu1 %v809_v25, %s2535_s20  ;;  %v2372_v25 = vpack.c.bf16 %v1504_v24, %v1503_v23  ;;  %v1727_v23 = vld [vmem:[%s3002_s10 + $0x8] sm:$0xff] }
 0x359   : > { %2373 = vmatpush3.bf16.msra.mxu0 %v2372_v25 }
 0x35a   : > { %2374 = vmatprep.subr.bf16.mxu0 %v2530_v3 }
 0x35d   : > { %2376 = vmatpush3.bf16.msra.mxu0 %v2375_v28 }
 0x35e   : > { %2377 = vmatprep.subr.bf16.mxu0 %v2530_v3 }
 0x361   : > { %2379 = vmatpush3.bf16.msra.mxu0 %v2378_v33  ;;  %v1811_v33 = vld [vmem:[%s3004_s12] sm:$0xff] }
 0x362   : > { %2392 = vmatprep.subr.bf16.mxu0 %v2530_v3 }
 0x37b   : > { %1241 = vadd.xlane.f32.xlu1 %v1240_v61 }
 0x3d3   : > { %v1063_v1 = vpop.xlane.xlu1 %1062 }
 0x3d4   : > { %v1064_v2 = vsub.f32 %v1058_v55, %v1063_v1 }
 0x3d6   : > { %v1065_v5 = vmul.f32 1.442695, %v1064_v2 }
 0x3d7   : > { %v1416_v9 = vpop.permute.xlu1 %1415 }
 0x3d8   : > { %2450 = vpow2.f32 %v1065_v5 }
 0x3d9   : > { %2452 = vpow2.f32 %v1410_v4 }
 0x3e2   : > { %v2451_v6 = vpop.eup %2450 }
 0x3e3   : > { %2273 = vmatmul.mubr.msk.f32.vlgmr.msra.gmra.mrb[8].mxu1 %vm896_vm3, %v2451_v6  ;;  %v1067_v7 = vsel %vm896_vm3, %v2451_v6, 0.0  ;;  %v2453_v8 = vpop.eup %2452  ;;  %v1643_v6 = vld [vmem:[%s3000_s8] sm:$0xff] }
 0x3e4   : > { %2281 = vmatpush3.msra.mxu1 %v1244_v62  ;;  %1068 = vadd.xlane.f32.xlu0 %v1067_v7  ;;  %v1412_v10 = vsel %vm896_vm3, %v2453_v8, 0.0  ;;  %v1644_v7 = vld [vmem:[%s3000_s8 + $0x8] sm:$0xff] }
 0x3e5   : > { %2282 = vmatprep.mubr.msk.f32.mxu1 %vm2531_vm0, %v2532_v11  ;;  %2290 = vmatprep.subr.mxu1 %v2532_v11 }
 0x3e7   : > { %2283 = vmatmul.mubr.msk.f32.vlgmr.msra.gmra.mrb[10].mxu1 %vm896_vm3, %v2449_v60  ;;  %v1615_v60 = vlaneseq }
 0x3e8   : > { %2291 = vmatpush3.msra.mxu1 %v1416_v9  ;;  %1413 = vadd.xlane.f32.xlu0 %v1412_v10 }
 0x3e9   : > { %2292 = vmatprep.mubr.msk.f32.mxu1 %vm2531_vm0, %v2532_v11  ;;  %2380 = vmatprep.subr.bf16.mxu1 %v2530_v3  ;;  %v1616_v61 = vshrl.u32 %v1615_v60, 7 }
 0x3eb   : > { %2293 = vmatmul.mubr.msk.f32.vlgmr.msra.gmra.mrb[12].mxu1 %vm896_vm3, %v2453_v8  ;;  %v2846_v62 = vsub.s32 1, %v1616_v61  ;;  %v2854_v4 = vsub.s32 0, %v1616_v61  ;;  %v2381_v8 = vpack.c.bf16 %v1644_v7, %v1643_v6 }
 0x3ec   : > { %904 = vadd.xlane.f32.xlu0 %v903_v12  ;;  %2318 = vmatprep.mubr.msk.f32.mxu1 %vm2531_vm0, %v2532_v11 }
 0x3ed   : > { %v1637_v0 = vrot.slane %v1585_v63, %v2846_v62  ;;  %v1628_v5 = vrot.slane %v1585_v63, %v2854_v4  ;;  %2382 = vmatpush3.bf16.msra.mxu1 %v2381_v8 }
 0x3ee   : > { %2383 = vmatprep.subr.bf16.mxu1 %v2530_v3 }
 0x408   : > { %v1242_v22 = vpop.xlane.xlu1 %1241 }
 0x471   : > { %v1069_v13 = vpop.xlane.xlu0 %1068 }
 0x475   : > { %v1414_v15 = vpop.xlane.xlu0 %1413 }
 0x479   : > { %v905_v16 = vpop.xlane.xlu0 %904 }
 0x47a   : > { %2454 = vrcp.f32 %v905_v16  ;;  %v1584_v16 = vld [vmem:[%s2998_s6] sm:$0x3] }
 0x47b   : > { %2456 = vrcp.f32 %v1069_v13  ;;  %v1623_v21 = vrot.slane %v1584_v16, %v2846_v62 }
 0x47c   : > { %2458 = vrcp.f32 %v1242_v22  ;;  %v1726_v22 = vld [vmem:[%s3002_s10] sm:$0xff] }
 0x47d   : > { %2460 = vrcp.f32 %v1414_v15  ;;  %v2384_v27 = vpack.c.bf16 %v1727_v23, %v1726_v22 }
 0x484   : > { %v2455_v17 = vpop.eup %2454 }
 0x485   : > { %v981_v18 = vmul.f32 %v2455_v17, %v975_v52  ;;  %v2457_v31 = vpop.eup %2456  ;;  %v1618_v17 = vrot.slane %v1584_v16, %v2854_v4 }
 0x486   : > { %v2459_v36 = vpop.eup %2458 }
 0x487   : > { %982 = vst.msk [vmem:[#allocation2] sm:$0xff] %vm819_vm2, %v981_v18  ;;  %v2461_v40 = vpop.eup %2460 }
 0x4b6   : > { %v1143_v32 = vpop.f32.mrb[8].mxu1 }
 0x4b7   : > { %v1149_v34 = vmul.f32 %v2457_v31, %v1143_v32  ;;  %v2274_v35 = vpop.f32.mrb[9].mxu1  ;;  %v1896_v31 = vld [vmem:[%s3006_s14 + $0x8] sm:$0xff] }
 0x4b8   : > { %v2393_v32 = vpack.c.bf16 %v1896_v31, %v1895_v30 }
 0x4b9   : > { %1151 = vrot.lane.b32.xlu1 %v1149_v34, %s2536_s27  ;;  %v1812_v34 = vld [vmem:[%s3004_s12 + $0x8] sm:$0xff] }
 0x4ba   : > { %v1315_v37 = vpop.f32.mrb[10].mxu1  ;;  %v2387_v35 = vpack.c.bf16 %v1812_v34, %v1811_v33 }
 0x4bb   : > { %v1321_v38 = vmul.f32 %v2459_v36, %v1315_v37  ;;  %v2284_v39 = vpop.f32.mrb[11].mxu1  ;;  %v1813_v36 = vld [vmem:[%s3004_s12 + $0x10] sm:$0xff]  ;;  %v1814_v37 = vld [vmem:[%s3004_s12 + $0x18] sm:$0xff] }
 0x4bc   : > { %v2390_v39 = vpack.c.bf16 %v1814_v37, %v1813_v36 }
 0x4bd   : > { %1323 = vrot.lane.b32.xlu0 %v1321_v38, %s2537_s1  ;;  %s2539_s1 = smov [#allocation3]  }
 0x4be   : > { %v1487_v41 = vpop.f32.mrb[12].mxu1 }
 0x4bf   : > { %v1493_v42 = vmul.f32 %v2461_v40, %v1487_v41  ;;  %v2294_v43 = vpop.f32.mrb[13].mxu1  ;;  %v1897_v40 = vld [vmem:[%s3006_s14 + $0x10] sm:$0xff]  ;;  %v1898_v41 = vld [vmem:[%s3006_s14 + $0x18] sm:$0xff] }
 0x4c0   : > { %v2154_v43 = vld [vmem:[%s3001_s9] ss:$0 sm:$0xff] }
 0x4c1   : > { %1495 = vrot.lane.b32.xlu1 %v1493_v42, %s2538_s29  ;;  %v2396_v42 = vpack.c.bf16 %v1898_v41, %v1897_v40  ;;  %s2135_s29 = sshll.u32 %s575_s22, 3 }
 0x4c2   : > { %s577_s23 = scalar_lea.vmem [#allocation3], %s2135_s29  ;;  %s2470_s29 = sshll.u32 %s2539_s1, 4  ;;  %s2471_s29 = int_to_ptr.vmem [resolvable:$false] %s2470_s29 }
 0x52b   : > { %v1152_v44 = vpop.permute.xlu1 %1151 }
 0x52c   : > { %1155 = vst.msk [vmem:[#allocation2] sm:$0xff] %vm1154_vm4, %v1152_v44 }
 0x52f   : > { %v1324_v45 = vpop.permute.xlu0 %1323 }
 0x530   : > { %1327 = vst.msk [vmem:[#allocation2] sm:$0xff] %vm1326_vm5, %v1324_v45 }
 0x533   : > { %v1496_v46 = vpop.permute.xlu1 %1495 }
 0x534   : > { %1499 = vst.msk [vmem:[#allocation2] sm:$0xff] %vm1498_vm6, %v1496_v46 }
 0x53b   : > { %v1500_v47 = vld [vmem:[#allocation2] sm:$0xff] }
 0x53c   : > { %2312 = vmatmul.mubr.msk.f32.vlgmr.msra.gmra.mrb[8].mxu0 %vm1509_vm7, %v1500_v47 }
 0x53d   : > { %2347 = vmatprep.mubr.msk.f32.mxu0 %vm2531_vm0, %v2532_v11  ;;  %2394 = vmatpush3.bf16.msra.mxu0 %v2393_v32 }
 0x53e   : > { %2395 = vmatprep.subr.bf16.mxu0 %v2530_v3 }
 0x541   : > { %2397 = vmatpush3.bf16.msra.mxu0 %v2396_v42 }
 0x60f   : > { %v1579_v48 = vpop.f32.mrb[8].mxu0 }
 0x610   : > { %v1583_v49 = vadd.f32 %v1579_v48, %v2723_v14  ;;  %v2313_v50 = vpop.f32.mrb[9].mxu0 }
 0x612   : > { %1590 = vrot.lane.b32.xlu1 %v1583_v49, %s3017_s25  ;;  %v1586_v51 = vsel %vm819_vm2, %v1583_v49, 0.0 }
 0x613   : > { %1587 = vadd.xlane.f32.xlu0 %v1586_v51 }
 0x684   : > { %v1591_v52 = vpop.permute.xlu1 %1590 }
 0x685   : > { %v1593_v53 = vsel %vm819_vm2, %v1591_v52, 0.0 }
 0x686   : > { %1594 = vadd.xlane.f32.xlu1 %v1593_v53  ;;  %v2160_v53 = vld [vmem:[%s3007_s15] ss:$0 sm:$0xff] }
 0x6a0   : > { %v1588_v54 = vpop.xlane.xlu0 %1587 }
 0x713   : > { %v1595_v55 = vpop.xlane.xlu1 %1594 }
 0x714   : > { %v1596_v56 = vadd.f32 %v1595_v55, %v1588_v54 }
 0x716   : > { %v1597_v57 = vmul.f32 0.03125, %v1596_v56 }
 0x718   : > { %v1598_v58 = vsub.f32 %v1583_v49, %v1597_v57  ;;  %v2158_v57 = vld [vmem:[%s3005_s13] ss:$0 sm:$0xff] }
 0x71a   : > { %v1599_v59 = vmul.f32 %v1598_v58, %v1598_v58 }
 0x71c   : > { %1604 = vrot.lane.b32.xlu0 %v1599_v59, %s3017_s25  ;;  %v1600_v14 = vsel %vm819_vm2, %v1599_v59, 0.0 }
 0x71d   : > { %1601 = vadd.xlane.f32.xlu1 %v1600_v14 }
 0x720   : > { %1639 = vrot.lane.b32.xlu0 %v1637_v0, %s2536_s27 }
 0x78e   : > { %v1605_v1 = vpop.permute.xlu0 %1604 }
 0x78f   : > { %v1607_v2 = vsel %vm819_vm2, %v1605_v1, 0.0 }
 0x790   : > { %1608 = vadd.xlane.f32.xlu1 %v1607_v2 }
 0x792   : > { %v1640_v24 = vpop.permute.xlu0 %1639 }
 0x7a1   : > { %1630 = vrot.lane.b32.xlu1 %v1628_v5, %s2536_s27 }
 0x7aa   : > { %v1602_v9 = vpop.xlane.xlu1 %1601 }
 0x81d   : > { %v1609_v10 = vpop.xlane.xlu1 %1608 }
 0x81e   : > { %v1610_v12 = vadd.f32 %v1609_v10, %v1602_v9 }
 0x820   : > { %v1611_v13 = vmul.f32 0.03125, %v1610_v12 }
 0x821   : > { %v1631_v19 = vpop.permute.xlu1 %1630 }
 0x822   : > { %v1612_v15 = vadd.f32 1e-05, %v1611_v13  ;;  %v1986_v13 = vld [vmem:[%s3009_s17] sm:$0x3] }
 0x824   : > { %2462 = vrsqrt.f32 %v1612_v15  ;;  %v2041_v15 = vrot.slane %v1986_v13, %v2846_v62 }
 0x82e   : > { %v2463_v18 = vpop.eup %2462 }
 0x82f   : > { %v1614_v20 = vmul.f32 %v2463_v18, %v1598_v58  ;;  %v2032_v18 = vrot.slane %v1986_v13, %v2854_v4 }
 0x831   : > { %v1619_v25 = vmul.f32 %v1618_v17, %v1614_v20  ;;  %v1633_v26 = vmul.f32 %v1631_v19, %v1614_v20 }
 0x833   : > { %v1624_v28 = vadd.f32 %v1623_v21, %v1619_v25  ;;  %v1642_v29 = vadd.f32 %v1640_v24, %v1633_v26  ;;  %v1985_v24 = vld [vmem:[%s3008_s16] sm:$0x3] }
 0x834   : > { %v2021_v25 = vrot.slane %v1985_v24, %v2854_v4  ;;  %v2026_v30 = vrot.slane %v1985_v24, %v2846_v62 }
 0x835   : > { %2319 = vmatmul.mubr.msk.f32.vlgmr.msra.gmra.mrb[14].mxu1 %vm819_vm2, %v1624_v28  ;;  %1736 = vrot.lane.b32.xlu0 %v1642_v29, %s3017_s25  ;;  %s2063_s25 = sshll.u32 %s577_s23, 4  ;;  %s2950_s25 = int_to_ptr.vmem [resolvable:$true] %s2063_s25 }
 0x836   : > { %2385 = vmatpush3.bf16.msra.mxu1 %v2384_v27  ;;  %2325 = vmatprep.mubr.msk.f32.mxu1 %vm2531_vm0, %v2532_v11  ;;  %p2473_p0 = scmp.lt.s32.totalorder %s2950_s25, %s2471_s29 }
 0x837   : > { %2386 = vmatprep.subr.bf16.mxu1 %v2530_v3 }
 0x8a7   : > { %v1737_v38 = vpop.permute.xlu0 %1736 }
 0x8a8   : > { %2326 = vmatmul.mubr.msk.f32.vlgmr.msra.gmra.mrb[16].mxu1 %vm819_vm2, %v1737_v38 }
 0x8a9   : > { %2388 = vmatpush3.bf16.msra.mxu1 %v2387_v35  ;;  %2336 = vmatprep.mubr.msk.f32.mxu1 %vm2531_vm0, %v2532_v11 }
 0x8aa   : > { %2389 = vmatprep.subr.bf16.mxu1 %v2530_v3  ;;  %v2156_v3 = vld [vmem:[%s3003_s11] ss:$0 sm:$0xff] }
 0x8ad   : > { %2391 = vmatpush3.bf16.msra.mxu1 %v2390_v39 }
 0x908   : > { %v1721_v44 = vpop.f32.mrb[14].mxu1 }
 0x909   : > { %v1722_v45 = vadd.f32 %v2154_v43, %v1721_v44  ;;  %v2320_v11 = vpop.f32.mrb[15].mxu1 }
 0x90b   : > { %v1725_v46 = vmax.f32 %v1722_v45, 0.0 }
 0x90d   : > { %2337 = vmatmul.mubr.msk.f32.vlgmr.msra.gmra.mrb[18].mxu1 %vm591_vm1, %v1725_v46 }
 0x97b   : > { %v1806_v47 = vpop.f32.mrb[16].mxu1 }
 0x97c   : > { %v1807_v48 = vadd.f32 %v2156_v3, %v1806_v47  ;;  %v2327_v49 = vpop.f32.mrb[17].mxu1 }
 0x97e   : > { %v1810_v50 = vmax.f32 %v1807_v48, 0.0 }
 0x980   : > { %2348 = vmatmul.mubr.msk.f32.vlgmr.msra.gmra.mrb[10].mxu0 %vm591_vm1, %v1810_v50 }
 0x9e0   : > { %v1891_v51 = vpop.f32.mrb[18].mxu1 }
 0x9e1   : > { %v2338_v52 = vpop.f32.mrb[19].mxu1  ;;  %v1892_v58 = vadd.f32 %v2158_v57, %v1891_v51 }
 0x9e3   : > { %v1979_v59 = vadd.f32 %v1892_v58, %v1624_v28 }
 0x9e5   : > { %v1987_v14 = vsel %vm819_vm2, %v1979_v59, 0.0 }
 0xa53   : > { %v1975_v54 = vpop.f32.mrb[10].mxu0 }
 0xa54   : > { %v1976_v55 = vadd.f32 %v2160_v53, %v1975_v54  ;;  %v2349_v56 = vpop.f32.mrb[11].mxu0 }
 0xa56   : > { %1981 = vrot.lane.b32.xlu0 %v1976_v55, %s2536_s27 }
 0xa75   : > { %1988 = vadd.xlane.f32.xlu0 %v1987_v14 }
 0xac8   : > { %v1982_v60 = vpop.permute.xlu0 %1981 }
 0xac9   : > { %v1984_v61 = vadd.f32 %v1982_v60, %v1642_v29 }
 0xacb   : > { %1991 = vrot.lane.b32.xlu1 %v1984_v61, %s3032_s24 }
 0xb02   : > { %v1989_v1 = vpop.xlane.xlu0 %1988 }
 0xb3d   : > { %v1992_v63 = vpop.permute.xlu1 %1991 }
 0xb3e   : > { %v1994_v0 = vsel %vm819_vm2, %v1992_v63, 0.0 }
 0xb3f   : > { %1995 = vadd.xlane.f32.xlu1 %v1994_v0 }
 0xbcc   : > { %v1996_v2 = vpop.xlane.xlu1 %1995 }
 0xbcd   : > { %v1997_v5 = vadd.f32 %v1996_v2, %v1989_v1 }
 0xbcf   : > { %v1998_v6 = vmul.f32 0.03125, %v1997_v5 }
 0xbd1   : > { %v1999_v7 = vsub.f32 %v1979_v59, %v1998_v6  ;;  %v2000_v8 = vsub.f32 %v1984_v61, %v1998_v6 }
 0xbd3   : > { %v2005_v9 = vmul.f32 %v2000_v8, %v2000_v8  ;;  %v2001_v10 = vmul.f32 %v1999_v7, %v1999_v7 }
 0xbd5   : > { %2007 = vrot.lane.b32.xlu0 %v2005_v9, %s3032_s24  ;;  %v2002_v12 = vsel %vm819_vm2, %v2001_v10, 0.0 }
 0xbd6   : > { %2003 = vadd.xlane.f32.xlu1 %v2002_v12 }
 0xbd9   : > { %2043 = vrot.lane.b32.xlu0 %v2041_v15, %s2536_s27 }
 0xc47   : > { %v2008_v16 = vpop.permute.xlu0 %2007 }
 0xc48   : > { %v2010_v17 = vsel %vm819_vm2, %v2008_v16, 0.0 }
 0xc49   : > { %2011 = vadd.xlane.f32.xlu1 %v2010_v17 }
 0xc4b   : > { %v2044_v31 = vpop.permute.xlu0 %2043 }
 0xc5a   : > { %2034 = vrot.lane.b32.xlu1 %v2032_v18, %s2536_s27  ;;  %s2163_s27 = sshll.u32 %s2656_s0, 7  ;;  %s2466_s0 = scalar_lea.vmem %s2950_s25, 128 }
 0xc5b   : > { %s2948_s20 = scalar_lea.hbm %s3010_s18, %s2163_s27  ;;  %p2467_p11 = scmp.ne.s32.totalorder %s2950_s25, %s2466_s0 }
 0xc5c   : > { %s2472_s27 = scalar_lea.vmem %s2471_s29, 256 }
 0xc5d   : > { %p2468_p12 = pnand %p2467_p11, %p2673_p5  ;;  %p2474_p1 = scmp.lt.s32.totalorder %s2472_s27, %s2466_s0 }
 0xc5f   : > { %p2469_p13 = pneg %p2468_p12  ;;  %p2475_p2 = por %p2474_p1, %p2473_p0 }
 0xc61   : > { %p2476_p3 = pnand %p2475_p2, %p2469_p13 }
 0xc63   : > { %v2004_v19 = vpop.xlane.xlu1 %2003 }
 0xcd6   : > { %v2012_v20 = vpop.xlane.xlu1 %2011 }
 0xcd7   : > { %v2013_v21 = vadd.f32 %v2012_v20, %v2004_v19 }
 0xcd9   : > { %v2014_v22 = vmul.f32 0.03125, %v2013_v21 }
 0xcda   : > { %v2035_v27 = vpop.permute.xlu1 %2034 }
 0xcdb   : > { %v2015_v23 = vadd.f32 1e-05, %v2014_v22 }
 0xcdd   : > { %2464 = vrsqrt.f32 %v2015_v23 }
 0xce7   : > { %v2465_v26 = vpop.eup %2464 }
 0xce8   : > { %v2017_v28 = vmul.f32 %v2465_v26, %v1999_v7  ;;  %v2028_v29 = vmul.f32 %v2465_v26, %v2000_v8 }
 0xcea   : > { %v2037_v32 = vmul.f32 %v2035_v27, %v2028_v29  ;;  %v2022_v33 = vmul.f32 %v2021_v25, %v2017_v28 }
 0xcec   : > { %v2046_v34 = vadd.f32 %v2044_v31, %v2037_v32  ;;  %v2027_v35 = vadd.f32 %v2026_v30, %v2022_v33 }
 0xcee   : > { %2047 = vst.msk [vmem:[%s577_s23] sm:$0xff] %vm819_vm2, %v2027_v35 }
 0xcef   : > { %2048 = vst.msk [vmem:[%s577_s23] sm:$0xff] %vm1154_vm4, %v2046_v34 }
 0xcf0   : > { %2479 = shalt.err (!%p2476_p3)
}
 0xcf1   : > { %s2480_s22 = scalar_lea.hbm %s2948_s20, 128  ;;  %s2484_s19 = scalar_lea.hbm %s3010_s18, 256 }
 0xcf2   : > { %p2481_p4 = scmp.ne.s32.totalorder %s2948_s20, %s2480_s22  ;;  %p2485_p9 = scmp.lt.u32.totalorder %s2948_s20, %s3010_s18 }
 0xcf3   : > { %p2486_p10 = scmp.lt.u32.totalorder %s2484_s19, %s2480_s22  ;;  %p2488_p12 = scmp.lt.u32.totalorder %s2480_s22, %s2948_s20 }
 0xcf4   : > { %p2482_p7 = pnand %p2481_p4, %p2673_p5 }
 0xcf5   : > { %p2487_p11 = por %p2486_p10, %p2485_p9 }
 0xcf6   : > { %p2483_p8 = pneg %p2482_p7 }
 0xcf7   : > { %p2489_p13 = por %p2488_p12, %p2487_p11 }
 0xcf9   : > { %p2490_p0 = pnand %p2489_p13, %p2483_p8 }
 0xcfb   : > { %2493 = shalt.err (!%p2490_p0)
}
 0xcfc   : > { %2398 = dma.vmem_to_hbm [thread:$0]  (%p2673_p5), %s2950_s25, 128, %s2948_s20, %s2050_s21  }
 0xcfd PF: > { %s3033_s0 = sld [smem:[#allocation6_spill]]  ;;  %p2404_p1 = scmp.ge.s32.totalorder %s2528_s30, 2 }
 0xcff   : > { %p2401_p2 = pnand %p2404_p1, %p2677_p6 }
 0xd03   : > { %s2075_s23 = sand.u32 1, %s3033_s0  }
 0xd04   : > { %s2076_s24 = scalar_lea.sflag [#allocation4], %s2075_s23 }
 0xd05   : > { %2511 = dma.done.wait (!%p2401_p2), %s2076_s24, 128  }
 0xd06   : > { %2513 = vsyncadd (!%p2401_p2), %s2076_s24, 4294967168  ;;  %s3035_s30 = sld [smem:[#allocation8_spill]]  ;;  %s3036_s22 = sld [smem:[#allocation7_spill]] }
 0xd07   : > { %s3037_s29 = sld [smem:[#allocation9_spill]]  ;;  %s3038_s27 = smov %s2520_s28 }
 0xd0c   : > { %p28_p3 = scmp.ge.s32.totalorder %s3035_s30, 4   ;;  %s3039_s28 = smov %s3036_s22 }
 0xd0e   :  { %30 = sbr.rel (!%p28_p3) target bundleno = 7 (0x7), region = 130 }
 0xd15   :  { %2081 = vsyncpa [#allocation4], 1 }
 0xd16   :  { %2083 = vsyncpa [#allocation4 + $0x1], 1 }

</bundles_post_ra>
